<compile_context>
chip_gen: v7x
topology: tpu7x:2x2x1
jax: 0.10.0
libtpu: 0.0.40
codegen_flags: <defaults>
</compile_context>

<pallas_src>
import numpy as np
import jax
import jax.numpy as jnp
from jax.experimental import pallas as pl
from jax.experimental.pallas import tpu as pltpu


# -----------------------------------------------------------------------------
# Model hyper-parameters (match the PyTorch module defaults).
# -----------------------------------------------------------------------------
OBS_SHAPE = (4, 16, 16)      # (C, H, W)
NUM_FILTERS = 32
FEATURE_DIM = 50
NUM_ACTIONS = 6
KERNEL = 3
STRIDE = 2
LN_EPS = 1e-5
MIN_STD = 1e-12

C_IN, IMG_H, IMG_W = OBS_SHAPE
OH1 = (IMG_H - KERNEL) // STRIDE + 1        # 7
OW1 = (IMG_W - KERNEL) // STRIDE + 1        # 7
OH2 = (OH1 - KERNEL) // STRIDE + 1          # 3
OW2 = (OW1 - KERNEL) // STRIDE + 1          # 3
NPOS1 = OH1 * OW1                           # 49 unique conv1 positions
NSPOT = OH2 * OW2                           # 9 conv2 output positions
NTAP = KERNEL * KERNEL                      # 9 conv2 taps
K1 = KERNEL * KERNEL * C_IN                 # 36  (conv1 im2col width)
K2 = NTAP * NUM_FILTERS                     # 288 (folded conv2 / fc contraction)
NHEAD = 1 + NUM_ACTIONS                     # 7 = [critic value | action mean]
OUT_LANES = 128                             # lane-dense output slab width
MAX_BATCH_BLOCK = 256                       # fits comfortably on v5e/v6e/v7x VMEM


# -----------------------------------------------------------------------------
# Fused Pallas kernel (one grid step = one batch block)
# -----------------------------------------------------------------------------
def _fused_forward_kernel(p_ref, w1_ref, w2_ref, wfc_ref, wh_ref,
                          bcv_ref, v50_ref, bh_ref, out_ref):
    """Fused forward, everything VMEM-resident.

    p_ref   : (49, BB, K1)   conv1 im2col patches, rows (h*7+w, b)
    w1_ref  : (K1, F1)       conv1 weight (im2col layout)
    w2_ref  : (K2, F1)       conv2 weight, K-folded over the 9 taps
    wfc_ref : (K2, D)        fc weight, K-folded over the 9 spatial slots
    wh_ref  : (D, 7)         [critic_w^T | fc_mean_w^T]
    bcv_ref : (2, F1)        [conv1_b ; conv2_b]
    v50_ref : (3, D)         [fc_b ; ln_gamma ; ln_beta]
    bh_ref  : (1, 7)         [critic_b , fc_mean_b]
    out_ref : (BB, 128)      [features | value | mean | 0-pad]
    """
    npos, bb, k1 = p_ref.shape
    f1 = w1_ref.shape[1]
    d = wfc_ref.shape[1]
    nh = wh_ref.shape[1]

    # ---- conv1 (+bias, relu): ONE MXU pass over the 49 unique positions ----
    x1 = p_ref[...].reshape(npos * bb, k1)               # leading-dim merge, BB%8==0
    y1 = jnp.maximum(
        jnp.dot(x1, w1_ref[...], preferred_element_type=jnp.float32)
        + bcv_ref[0:1, :], 0.0)                          # (49*BB, F1)

    def y1_block(h, w):                                  # sublane-aligned static slice
        r0 = (h * OW1 + w) * bb
        return y1[r0:r0 + bb, :]

    # ---- conv2 K-folding: X2[(p*3+q)*BB+b, (i*3+j)*F1+c] = y1(2p+i,2q+j,b,c) -
    tap_cols = []
    for i in range(KERNEL):
        for j in range(KERNEL):
            rows = [y1_block(STRIDE * p + i, STRIDE * q + j)
                    for p in range(OH2) for q in range(OW2)]
            tap_cols.append(jnp.concatenate(rows, axis=0))      # (NSPOT*BB, F1)
    x2 = jnp.concatenate(tap_cols, axis=-1)                     # (NSPOT*BB, 288)

    y2 = jnp.maximum(
        jnp.dot(x2, w2_ref[...], preferred_element_type=jnp.float32)
        + bcv_ref[1:2, :], 0.0)                                 # (NSPOT*BB, F1)

    # ---- fc K-folding (torch NCHW flatten folded into wfc layout) ----------
    xf = jnp.concatenate(
        [y2[s * bb:(s + 1) * bb, :] for s in range(NSPOT)], axis=-1)  # (BB, 288)
    z = (jnp.dot(xf, wfc_ref[...], preferred_element_type=jnp.float32)
         + v50_ref[0:1, :])                                     # (BB, D)

    # ---- LayerNorm(eps=1e-5) over the true D=50 -> tanh --------------------
    mu = jnp.mean(z, axis=-1, keepdims=True)
    var = jnp.mean(jnp.square(z - mu), axis=-1, keepdims=True)
    feat = jnp.tanh((z - mu) * jax.lax.rsqrt(var + LN_EPS) * v50_ref[1:2, :]
                    + v50_ref[2:3, :])                          # (BB, D)

    # ---- critic value + DiagGaussian mean in one small MXU op --------------
    head = (jnp.dot(feat, wh_ref[...], preferred_element_type=jnp.float32)
            + bh_ref[0:1, :])                                   # (BB, 7)

    # ---- single full-width lane-dense store ---------------------------------
    pad = jnp.zeros((bb, out_ref.shape[1] - d - nh), jnp.float32)
    out_ref[...] = jnp.concatenate([feat, head, pad], axis=-1)


# -----------------------------------------------------------------------------
# Parameter init (torch layouts) and one-time kernel-ready preparation
# -----------------------------------------------------------------------------
def init_params(key):
    ks = jax.random.split(key, 10)

    def uni(k, shape, fan_in):
        bound = 1.0 / float(np.sqrt(fan_in))
        return jax.random.uniform(k, shape, jnp.float32, -bound, bound)

    out_dim = NUM_FILTERS * OH2 * OW2
    return {
        "conv1_w": uni(ks[0], (NUM_FILTERS, C_IN, KERNEL, KERNEL),
                       C_IN * KERNEL * KERNEL),
        "conv1_b": uni(ks[1], (NUM_FILTERS,), C_IN * KERNEL * KERNEL),
        "conv2_w": uni(ks[2], (NUM_FILTERS, NUM_FILTERS, KERNEL, KERNEL),
                       NUM_FILTERS * KERNEL * KERNEL),
        "conv2_b": uni(ks[3], (NUM_FILTERS,), NUM_FILTERS * KERNEL * KERNEL),
        "fc_w": uni(ks[4], (FEATURE_DIM, out_dim), out_dim),
        "fc_b": uni(ks[5], (FEATURE_DIM,), out_dim),
        "ln_g": jnp.ones((FEATURE_DIM,), jnp.float32),
        "ln_b": jnp.zeros((FEATURE_DIM,), jnp.float32),
        "critic_w": uni(ks[6], (1, FEATURE_DIM), FEATURE_DIM),
        "critic_b": uni(ks[7], (1,), FEATURE_DIM),
        "fc_mean_w": uni(ks[8], (NUM_ACTIONS, FEATURE_DIM), FEATURE_DIM),
        "fc_mean_b": uni(ks[9], (NUM_ACTIONS,), FEATURE_DIM),
        "logstd": -0.25 * jnp.ones((NUM_ACTIONS,), jnp.float32),
    }


def prepare_params(p):
    """One-time conversion of torch-layout params to kernel-ready layouts."""
    # conv1: (F1, C, KH, KW) -> (K1, F1); rows ordered (ki*3+kj)*C + c
    w1 = jnp.transpose(p["conv1_w"], (2, 3, 1, 0)).reshape(K1, NUM_FILTERS)
    # conv2: (F2, F1, KH, KW) -> (K2, F2); rows ordered (ki*3+kj)*F1 + c_in
    w2 = jnp.transpose(p["conv2_w"], (2, 3, 1, 0)).reshape(K2, NUM_FILTERS)
    # fc: fold torch NCHW flatten (idx = c*9 + s) -> rows ordered s*F1 + c
    wfc = jnp.transpose(
        p["fc_w"].reshape(FEATURE_DIM, NUM_FILTERS, OH2, OW2),
        (2, 3, 1, 0)).reshape(K2, FEATURE_DIM)
    # head: critic folded next to action mean
    wh = jnp.concatenate([p["critic_w"].T, p["fc_mean_w"].T], axis=1)  # (D, 7)
    bcv = jnp.stack([p["conv1_b"], p["conv2_b"]], axis=0)              # (2, F1)
    v50 = jnp.stack([p["fc_b"], p["ln_g"], p["ln_b"]], axis=0)         # (3, D)
    bh = jnp.concatenate([p["critic_b"], p["fc_mean_b"]]).reshape(1, NHEAD)
    # std is input-independent -> computed once on the host, not in the kernel
    std_row = (jnp.exp(p["logstd"]) + MIN_STD).reshape(1, NUM_ACTIONS)
    return {"w1": w1, "w2": w2, "wfc": wfc, "wh": wh,
            "bcv": bcv, "v50": v50, "bh": bh, "std_row": std_row}


# -----------------------------------------------------------------------------
# Wrapper glue: 49-position im2col patches + gridded fused pallas_call
# -----------------------------------------------------------------------------
def _pad_to_block(b):
    b8 = ((b + 7) // 8) * 8                  # sublane-align the batch
    bb = min(b8, MAX_BATCH_BLOCK)
    b_pad = ((b8 + bb - 1) // bb) * bb
    return b_pad, bb


def _build_patches(obs_nchw, b_pad):
    """conv1 im2col patches for the 49 UNIQUE positions, shape (49, B_pad, K1)."""
    b = obs_nchw.shape[0]
    x = jnp.transpose(obs_nchw, (0, 2, 3, 1)).astype(jnp.float32)   # NHWC
    cols = []
    for i in range(KERNEL):
        for j in range(KERNEL):
            cols.append(x[:, i:i + STRIDE * (OH1 - 1) + 1:STRIDE,
                          j:j + STRIDE * (OW1 - 1) + 1:STRIDE, :])
    patches = jnp.concatenate(cols, axis=-1)                 # (B, 7, 7, K1)
    patches = jnp.transpose(patches.reshape(b, NPOS1, K1), (1, 0, 2))
    if b_pad > b:
        patches = jnp.pad(patches, ((0, 0), (0, b_pad - b), (0, 0)))
    return patches


@jax.jit
def forward(kparams, obs_nchw):
    """Fused ActorCritic + DiagGaussian forward.

    Returns (state_value, features, action_mean, action_std); (mean, std) are
    the FixedNormal parameters the PyTorch DiagGaussian.forward() returns
    (mean = fc_mean(x), std = exp(logstd) + 1e-12).
    """
    b = obs_nchw.shape[0]
    b_pad, bb = _pad_to_block(b)
    patches = _build_patches(obs_nchw, b_pad)

    const2 = lambda i: (0, 0)        # weights: fetched once, stay VMEM-resident

    out = pl.pallas_call(
        _fused_forward_kernel,
        out_shape=jax.ShapeDtypeStruct((b_pad, OUT_LANES), jnp.float32),
        grid=(b_pad // bb,),
        in_specs=[
            pl.BlockSpec((NPOS1, bb, K1), lambda i: (0, i, 0)),   # patches
            pl.BlockSpec((K1, NUM_FILTERS), const2),              # w1
            pl.BlockSpec((K2, NUM_FILTERS), const2),              # w2 (folded)
            pl.BlockSpec((K2, FEATURE_DIM), const2),              # wfc (folded)
            pl.BlockSpec((FEATURE_DIM, NHEAD), const2),           # head weight
            pl.BlockSpec((2, NUM_FILTERS), const2),               # conv biases
            pl.BlockSpec((3, FEATURE_DIM), const2),               # fc_b/ln_g/ln_b
            pl.BlockSpec((1, NHEAD), const2),                     # head bias
        ],
        out_specs=pl.BlockSpec((bb, OUT_LANES), lambda i: (i, 0)),
        compiler_params=pltpu.CompilerParams(
            dimension_semantics=("parallel",)),
    )(patches, kparams["w1"], kparams["w2"], kparams["wfc"], kparams["wh"],
      kparams["bcv"], kparams["v50"], kparams["bh"])

    feat = out[:b, 0:FEATURE_DIM]
    value = out[:b, FEATURE_DIM:FEATURE_DIM + 1]
    mean = out[:b, FEATURE_DIM + 1:FEATURE_DIM + 1 + NUM_ACTIONS]
    std = jnp.broadcast_to(kparams["std_row"], (b, NUM_ACTIONS))
    return value, feat, mean, std

# TODO(synk): FixedNormal.sample()/log_probs() need a PRNG draw / action input
# outside this deterministic forward; they consume the (mean, std) returned here.


# -----------------------------------------------------------------------------
# Plain-JAX reference (torch semantics) for correctness checking
# -----------------------------------------------------------------------------
def reference_forward(p, obs_nchw):
    x = obs_nchw.astype(jnp.float32)
    dn1 = jax.lax.conv_dimension_numbers(x.shape, p["conv1_w"].shape,
                                         ("NCHW", "OIHW", "NCHW"))
    y = jax.lax.conv_general_dilated(x, p["conv1_w"], (STRIDE, STRIDE),
                                     "VALID", dimension_numbers=dn1)
    y = jax.nn.relu(y + p["conv1_b"][None, :, None, None])
    dn2 = jax.lax.conv_dimension_numbers(y.shape, p["conv2_w"].shape,
                                         ("NCHW", "OIHW", "NCHW"))
    y = jax.lax.conv_general_dilated(y, p["conv2_w"], (STRIDE, STRIDE),
                                     "VALID", dimension_numbers=dn2)
    y = jax.nn.relu(y + p["conv2_b"][None, :, None, None])
    h = y.reshape(y.shape[0], -1)                       # torch NCHW .view(B,-1)
    z = h @ p["fc_w"].T + p["fc_b"]
    mu = z.mean(-1, keepdims=True)
    var = ((z - mu) ** 2).mean(-1, keepdims=True)
    feat = jnp.tanh((z - mu) / jnp.sqrt(var + LN_EPS) * p["ln_g"] + p["ln_b"])
    value = feat @ p["critic_w"].T + p["critic_b"]
    mean = feat @ p["fc_mean_w"].T + p["fc_mean_b"]
    std = jnp.broadcast_to(jnp.exp(p["logstd"]) + MIN_STD, mean.shape)
    return value, feat, mean, std


if __name__ == "__main__":
    key = jax.random.PRNGKey(0)
    kp, kx = jax.random.split(key)

    B = 2
    params = init_params(kp)
    kparams = prepare_params(params)        # one-time kernel-ready layouts
    obs = jax.random.normal(kx, (B,) + OBS_SHAPE, jnp.float32)

    value, feat, mean, std = forward(kparams, obs)
    jax.block_until_ready((value, feat, mean, std))

    v_ref, f_ref, m_ref, s_ref = reference_forward(params, obs)
    assert value.shape == (B, 1) and feat.shape == (B, FEATURE_DIM)
    assert mean.shape == (B, NUM_ACTIONS) and std.shape == (B, NUM_ACTIONS)
    assert jnp.allclose(value, v_ref, atol=1e-4, rtol=1e-4)
    assert jnp.allclose(feat, f_ref, atol=1e-4, rtol=1e-4)
    assert jnp.allclose(mean, m_ref, atol=1e-4, rtol=1e-4)
    assert jnp.allclose(std, s_ref, atol=1e-4, rtol=1e-4)

    print("KERNEL_OK")
</pallas_src>

<mosaic_0001>
module attributes {stable_mosaic.version = 11 : i64} {
  func.func @_fused_forward_kernel(%arg0: i32, %arg1: memref<49x8x36xf32, #tpu.memory_space<vmem>>, %arg2: memref<36x32xf32, #tpu.memory_space<vmem>>, %arg3: memref<288x32xf32, #tpu.memory_space<vmem>>, %arg4: memref<288x50xf32, #tpu.memory_space<vmem>>, %arg5: memref<50x7xf32, #tpu.memory_space<vmem>>, %arg6: memref<2x32xf32, #tpu.memory_space<vmem>>, %arg7: memref<3x50xf32, #tpu.memory_space<vmem>>, %arg8: memref<1x7xf32, #tpu.memory_space<vmem>>, %arg9: memref<8x128xf32, #tpu.memory_space<vmem>>) attributes {dimension_semantics = [#tpu.dimension_semantics<parallel>], iteration_bounds = array<i64: 1>, scalar_prefetch = 0 : i64, scratch_operands = 0 : i64, tpu.core_type = #tpu.core_type<tc>, window_params = [{transform_indices = @transform_0, window_bounds = array<i64: 49, 8, 36>}, {pipeline_mode = #tpu.pipeline_mode<synchronous>, transform_indices = @transform_1, window_bounds = array<i64: 36, 32>}, {pipeline_mode = #tpu.pipeline_mode<synchronous>, transform_indices = @transform_2, window_bounds = array<i64: 288, 32>}, {pipeline_mode = #tpu.pipeline_mode<synchronous>, transform_indices = @transform_3, window_bounds = array<i64: 288, 50>}, {pipeline_mode = #tpu.pipeline_mode<synchronous>, transform_indices = @transform_4, window_bounds = array<i64: 50, 7>}, {pipeline_mode = #tpu.pipeline_mode<synchronous>, transform_indices = @transform_5, window_bounds = array<i64: 2, 32>}, {pipeline_mode = #tpu.pipeline_mode<synchronous>, transform_indices = @transform_6, window_bounds = array<i64: 3, 50>}, {pipeline_mode = #tpu.pipeline_mode<synchronous>, transform_indices = @transform_7, window_bounds = array<i64: 1, 7>}, {transform_indices = @transform_8, window_bounds = array<i64: 8, 128>}]} {
    %c0 = arith.constant 0 : index
    %c0_0 = arith.constant 0 : index
    %c0_1 = arith.constant 0 : index
    %0 = vector.load %arg1[%c0, %c0_0, %c0_1] : memref<49x8x36xf32, #tpu.memory_space<vmem>>, vector<49x8x36xf32>
    %1 = vector.shape_cast %0 : vector<49x8x36xf32> to vector<392x36xf32>
    %c0_2 = arith.constant 0 : index
    %c0_3 = arith.constant 0 : index
    %2 = vector.load %arg2[%c0_2, %c0_3] : memref<36x32xf32, #tpu.memory_space<vmem>>, vector<36x32xf32>
    %cst = arith.constant dense<0.000000e+00> : vector<392x32xf32>
    %3 = tpu.matmul %1, %2, %cst {dimension_numbers = #tpu.dot_dimension_numbers<[1], [0], [0], [1], [0, 0, 1, 1], [], []>} : vector<392x36xf32>, vector<36x32xf32>, vector<392x32xf32> -> vector<392x32xf32>
    %c0_4 = arith.constant 0 : index
    %c0_5 = arith.constant 0 : index
    %4 = vector.load %arg6[%c0_4, %c0_5] : memref<2x32xf32, #tpu.memory_space<vmem>>, vector<1x32xf32>
    %5 = vector.broadcast %4 : vector<1x32xf32> to vector<392x32xf32>
    %6 = arith.addf %3, %5 : vector<392x32xf32>
    %cst_6 = arith.constant 0.000000e+00 : f32
    %7 = vector.broadcast %cst_6 : f32 to vector<392x32xf32>
    %8 = arith.maximumf %6, %7 : vector<392x32xf32>
    %9 = vector.extract_strided_slice %8 {offsets = [0, 0], sizes = [8, 32], strides = [1, 1]} : vector<392x32xf32> to vector<8x32xf32>
    %10 = vector.extract_strided_slice %8 {offsets = [16, 0], sizes = [8, 32], strides = [1, 1]} : vector<392x32xf32> to vector<8x32xf32>
    %11 = vector.extract_strided_slice %8 {offsets = [32, 0], sizes = [8, 32], strides = [1, 1]} : vector<392x32xf32> to vector<8x32xf32>
    %12 = vector.extract_strided_slice %8 {offsets = [112, 0], sizes = [8, 32], strides = [1, 1]} : vector<392x32xf32> to vector<8x32xf32>
    %13 = vector.extract_strided_slice %8 {offsets = [128, 0], sizes = [8, 32], strides = [1, 1]} : vector<392x32xf32> to vector<8x32xf32>
    %14 = vector.extract_strided_slice %8 {offsets = [144, 0], sizes = [8, 32], strides = [1, 1]} : vector<392x32xf32> to vector<8x32xf32>
    %15 = vector.extract_strided_slice %8 {offsets = [224, 0], sizes = [8, 32], strides = [1, 1]} : vector<392x32xf32> to vector<8x32xf32>
    %16 = vector.extract_strided_slice %8 {offsets = [240, 0], sizes = [8, 32], strides = [1, 1]} : vector<392x32xf32> to vector<8x32xf32>
    %17 = vector.extract_strided_slice %8 {offsets = [256, 0], sizes = [8, 32], strides = [1, 1]} : vector<392x32xf32> to vector<8x32xf32>
    %18 = tpu.concatenate %9, %10, %11, %12, %13, %14, %15, %16, %17 in 0 : vector<8x32xf32>, vector<8x32xf32>, vector<8x32xf32>, vector<8x32xf32>, vector<8x32xf32>, vector<8x32xf32>, vector<8x32xf32>, vector<8x32xf32>, vector<8x32xf32> -> vector<72x32xf32>
    %19 = vector.extract_strided_slice %8 {offsets = [8, 0], sizes = [8, 32], strides = [1, 1]} : vector<392x32xf32> to vector<8x32xf32>
    %20 = vector.extract_strided_slice %8 {offsets = [24, 0], sizes = [8, 32], strides = [1, 1]} : vector<392x32xf32> to vector<8x32xf32>
    %21 = vector.extract_strided_slice %8 {offsets = [40, 0], sizes = [8, 32], strides = [1, 1]} : vector<392x32xf32> to vector<8x32xf32>
    %22 = vector.extract_strided_slice %8 {offsets = [120, 0], sizes = [8, 32], strides = [1, 1]} : vector<392x32xf32> to vector<8x32xf32>
    %23 = vector.extract_strided_slice %8 {offsets = [136, 0], sizes = [8, 32], strides = [1, 1]} : vector<392x32xf32> to vector<8x32xf32>
    %24 = vector.extract_strided_slice %8 {offsets = [152, 0], sizes = [8, 32], strides = [1, 1]} : vector<392x32xf32> to vector<8x32xf32>
    %25 = vector.extract_strided_slice %8 {offsets = [232, 0], sizes = [8, 32], strides = [1, 1]} : vector<392x32xf32> to vector<8x32xf32>
    %26 = vector.extract_strided_slice %8 {offsets = [248, 0], sizes = [8, 32], strides = [1, 1]} : vector<392x32xf32> to vector<8x32xf32>
    %27 = vector.extract_strided_slice %8 {offsets = [264, 0], sizes = [8, 32], strides = [1, 1]} : vector<392x32xf32> to vector<8x32xf32>
    %28 = tpu.concatenate %19, %20, %21, %22, %23, %24, %25, %26, %27 in 0 : vector<8x32xf32>, vector<8x32xf32>, vector<8x32xf32>, vector<8x32xf32>, vector<8x32xf32>, vector<8x32xf32>, vector<8x32xf32>, vector<8x32xf32>, vector<8x32xf32> -> vector<72x32xf32>
    %29 = vector.extract_strided_slice %8 {offsets = [16, 0], sizes = [8, 32], strides = [1, 1]} : vector<392x32xf32> to vector<8x32xf32>
    %30 = vector.extract_strided_slice %8 {offsets = [32, 0], sizes = [8, 32], strides = [1, 1]} : vector<392x32xf32> to vector<8x32xf32>
    %31 = vector.extract_strided_slice %8 {offsets = [48, 0], sizes = [8, 32], strides = [1, 1]} : vector<392x32xf32> to vector<8x32xf32>
    %32 = vector.extract_strided_slice %8 {offsets = [128, 0], sizes = [8, 32], strides = [1, 1]} : vector<392x32xf32> to vector<8x32xf32>
    %33 = vector.extract_strided_slice %8 {offsets = [144, 0], sizes = [8, 32], strides = [1, 1]} : vector<392x32xf32> to vector<8x32xf32>
    %34 = vector.extract_strided_slice %8 {offsets = [160, 0], sizes = [8, 32], strides = [1, 1]} : vector<392x32xf32> to vector<8x32xf32>
    %35 = vector.extract_strided_slice %8 {offsets = [240, 0], sizes = [8, 32], strides = [1, 1]} : vector<392x32xf32> to vector<8x32xf32>
    %36 = vector.extract_strided_slice %8 {offsets = [256, 0], sizes = [8, 32], strides = [1, 1]} : vector<392x32xf32> to vector<8x32xf32>
    %37 = vector.extract_strided_slice %8 {offsets = [272, 0], sizes = [8, 32], strides = [1, 1]} : vector<392x32xf32> to vector<8x32xf32>
    %38 = tpu.concatenate %29, %30, %31, %32, %33, %34, %35, %36, %37 in 0 : vector<8x32xf32>, vector<8x32xf32>, vector<8x32xf32>, vector<8x32xf32>, vector<8x32xf32>, vector<8x32xf32>, vector<8x32xf32>, vector<8x32xf32>, vector<8x32xf32> -> vector<72x32xf32>
    %39 = vector.extract_strided_slice %8 {offsets = [56, 0], sizes = [8, 32], strides = [1, 1]} : vector<392x32xf32> to vector<8x32xf32>
    %40 = vector.extract_strided_slice %8 {offsets = [72, 0], sizes = [8, 32], strides = [1, 1]} : vector<392x32xf32> to vector<8x32xf32>
    %41 = vector.extract_strided_slice %8 {offsets = [88, 0], sizes = [8, 32], strides = [1, 1]} : vector<392x32xf32> to vector<8x32xf32>
    %42 = vector.extract_strided_slice %8 {offsets = [168, 0], sizes = [8, 32], strides = [1, 1]} : vector<392x32xf32> to vector<8x32xf32>
    %43 = vector.extract_strided_slice %8 {offsets = [184, 0], sizes = [8, 32], strides = [1, 1]} : vector<392x32xf32> to vector<8x32xf32>
    %44 = vector.extract_strided_slice %8 {offsets = [200, 0], sizes = [8, 32], strides = [1, 1]} : vector<392x32xf32> to vector<8x32xf32>
    %45 = vector.extract_strided_slice %8 {offsets = [280, 0], sizes = [8, 32], strides = [1, 1]} : vector<392x32xf32> to vector<8x32xf32>
    %46 = vector.extract_strided_slice %8 {offsets = [296, 0], sizes = [8, 32], strides = [1, 1]} : vector<392x32xf32> to vector<8x32xf32>
    %47 = vector.extract_strided_slice %8 {offsets = [312, 0], sizes = [8, 32], strides = [1, 1]} : vector<392x32xf32> to vector<8x32xf32>
    %48 = tpu.concatenate %39, %40, %41, %42, %43, %44, %45, %46, %47 in 0 : vector<8x32xf32>, vector<8x32xf32>, vector<8x32xf32>, vector<8x32xf32>, vector<8x32xf32>, vector<8x32xf32>, vector<8x32xf32>, vector<8x32xf32>, vector<8x32xf32> -> vector<72x32xf32>
    %49 = vector.extract_strided_slice %8 {offsets = [64, 0], sizes = [8, 32], strides = [1, 1]} : vector<392x32xf32> to vector<8x32xf32>
    %50 = vector.extract_strided_slice %8 {offsets = [80, 0], sizes = [8, 32], strides = [1, 1]} : vector<392x32xf32> to vector<8x32xf32>
    %51 = vector.extract_strided_slice %8 {offsets = [96, 0], sizes = [8, 32], strides = [1, 1]} : vector<392x32xf32> to vector<8x32xf32>
    %52 = vector.extract_strided_slice %8 {offsets = [176, 0], sizes = [8, 32], strides = [1, 1]} : vector<392x32xf32> to vector<8x32xf32>
    %53 = vector.extract_strided_slice %8 {offsets = [192, 0], sizes = [8, 32], strides = [1, 1]} : vector<392x32xf32> to vector<8x32xf32>
    %54 = vector.extract_strided_slice %8 {offsets = [208, 0], sizes = [8, 32], strides = [1, 1]} : vector<392x32xf32> to vector<8x32xf32>
    %55 = vector.extract_strided_slice %8 {offsets = [288, 0], sizes = [8, 32], strides = [1, 1]} : vector<392x32xf32> to vector<8x32xf32>
    %56 = vector.extract_strided_slice %8 {offsets = [304, 0], sizes = [8, 32], strides = [1, 1]} : vector<392x32xf32> to vector<8x32xf32>
    %57 = vector.extract_strided_slice %8 {offsets = [320, 0], sizes = [8, 32], strides = [1, 1]} : vector<392x32xf32> to vector<8x32xf32>
    %58 = tpu.concatenate %49, %50, %51, %52, %53, %54, %55, %56, %57 in 0 : vector<8x32xf32>, vector<8x32xf32>, vector<8x32xf32>, vector<8x32xf32>, vector<8x32xf32>, vector<8x32xf32>, vector<8x32xf32>, vector<8x32xf32>, vector<8x32xf32> -> vector<72x32xf32>
    %59 = vector.extract_strided_slice %8 {offsets = [72, 0], sizes = [8, 32], strides = [1, 1]} : vector<392x32xf32> to vector<8x32xf32>
    %60 = vector.extract_strided_slice %8 {offsets = [88, 0], sizes = [8, 32], strides = [1, 1]} : vector<392x32xf32> to vector<8x32xf32>
    %61 = vector.extract_strided_slice %8 {offsets = [104, 0], sizes = [8, 32], strides = [1, 1]} : vector<392x32xf32> to vector<8x32xf32>
    %62 = vector.extract_strided_slice %8 {offsets = [184, 0], sizes = [8, 32], strides = [1, 1]} : vector<392x32xf32> to vector<8x32xf32>
    %63 = vector.extract_strided_slice %8 {offsets = [200, 0], sizes = [8, 32], strides = [1, 1]} : vector<392x32xf32> to vector<8x32xf32>
    %64 = vector.extract_strided_slice %8 {offsets = [216, 0], sizes = [8, 32], strides = [1, 1]} : vector<392x32xf32> to vector<8x32xf32>
    %65 = vector.extract_strided_slice %8 {offsets = [296, 0], sizes = [8, 32], strides = [1, 1]} : vector<392x32xf32> to vector<8x32xf32>
    %66 = vector.extract_strided_slice %8 {offsets = [312, 0], sizes = [8, 32], strides = [1, 1]} : vector<392x32xf32> to vector<8x32xf32>
    %67 = vector.extract_strided_slice %8 {offsets = [328, 0], sizes = [8, 32], strides = [1, 1]} : vector<392x32xf32> to vector<8x32xf32>
    %68 = tpu.concatenate %59, %60, %61, %62, %63, %64, %65, %66, %67 in 0 : vector<8x32xf32>, vector<8x32xf32>, vector<8x32xf32>, vector<8x32xf32>, vector<8x32xf32>, vector<8x32xf32>, vector<8x32xf32>, vector<8x32xf32>, vector<8x32xf32> -> vector<72x32xf32>
    %69 = vector.extract_strided_slice %8 {offsets = [112, 0], sizes = [8, 32], strides = [1, 1]} : vector<392x32xf32> to vector<8x32xf32>
    %70 = vector.extract_strided_slice %8 {offsets = [128, 0], sizes = [8, 32], strides = [1, 1]} : vector<392x32xf32> to vector<8x32xf32>
    %71 = vector.extract_strided_slice %8 {offsets = [144, 0], sizes = [8, 32], strides = [1, 1]} : vector<392x32xf32> to vector<8x32xf32>
    %72 = vector.extract_strided_slice %8 {offsets = [224, 0], sizes = [8, 32], strides = [1, 1]} : vector<392x32xf32> to vector<8x32xf32>
    %73 = vector.extract_strided_slice %8 {offsets = [240, 0], sizes = [8, 32], strides = [1, 1]} : vector<392x32xf32> to vector<8x32xf32>
    %74 = vector.extract_strided_slice %8 {offsets = [256, 0], sizes = [8, 32], strides = [1, 1]} : vector<392x32xf32> to vector<8x32xf32>
    %75 = vector.extract_strided_slice %8 {offsets = [336, 0], sizes = [8, 32], strides = [1, 1]} : vector<392x32xf32> to vector<8x32xf32>
    %76 = vector.extract_strided_slice %8 {offsets = [352, 0], sizes = [8, 32], strides = [1, 1]} : vector<392x32xf32> to vector<8x32xf32>
    %77 = vector.extract_strided_slice %8 {offsets = [368, 0], sizes = [8, 32], strides = [1, 1]} : vector<392x32xf32> to vector<8x32xf32>
    %78 = tpu.concatenate %69, %70, %71, %72, %73, %74, %75, %76, %77 in 0 : vector<8x32xf32>, vector<8x32xf32>, vector<8x32xf32>, vector<8x32xf32>, vector<8x32xf32>, vector<8x32xf32>, vector<8x32xf32>, vector<8x32xf32>, vector<8x32xf32> -> vector<72x32xf32>
    %79 = vector.extract_strided_slice %8 {offsets = [120, 0], sizes = [8, 32], strides = [1, 1]} : vector<392x32xf32> to vector<8x32xf32>
    %80 = vector.extract_strided_slice %8 {offsets = [136, 0], sizes = [8, 32], strides = [1, 1]} : vector<392x32xf32> to vector<8x32xf32>
    %81 = vector.extract_strided_slice %8 {offsets = [152, 0], sizes = [8, 32], strides = [1, 1]} : vector<392x32xf32> to vector<8x32xf32>
    %82 = vector.extract_strided_slice %8 {offsets = [232, 0], sizes = [8, 32], strides = [1, 1]} : vector<392x32xf32> to vector<8x32xf32>
    %83 = vector.extract_strided_slice %8 {offsets = [248, 0], sizes = [8, 32], strides = [1, 1]} : vector<392x32xf32> to vector<8x32xf32>
    %84 = vector.extract_strided_slice %8 {offsets = [264, 0], sizes = [8, 32], strides = [1, 1]} : vector<392x32xf32> to vector<8x32xf32>
    %85 = vector.extract_strided_slice %8 {offsets = [344, 0], sizes = [8, 32], strides = [1, 1]} : vector<392x32xf32> to vector<8x32xf32>
    %86 = vector.extract_strided_slice %8 {offsets = [360, 0], sizes = [8, 32], strides = [1, 1]} : vector<392x32xf32> to vector<8x32xf32>
    %87 = vector.extract_strided_slice %8 {offsets = [376, 0], sizes = [8, 32], strides = [1, 1]} : vector<392x32xf32> to vector<8x32xf32>
    %88 = tpu.concatenate %79, %80, %81, %82, %83, %84, %85, %86, %87 in 0 : vector<8x32xf32>, vector<8x32xf32>, vector<8x32xf32>, vector<8x32xf32>, vector<8x32xf32>, vector<8x32xf32>, vector<8x32xf32>, vector<8x32xf32>, vector<8x32xf32> -> vector<72x32xf32>
    %89 = vector.extract_strided_slice %8 {offsets = [128, 0], sizes = [8, 32], strides = [1, 1]} : vector<392x32xf32> to vector<8x32xf32>
    %90 = vector.extract_strided_slice %8 {offsets = [144, 0], sizes = [8, 32], strides = [1, 1]} : vector<392x32xf32> to vector<8x32xf32>
    %91 = vector.extract_strided_slice %8 {offsets = [160, 0], sizes = [8, 32], strides = [1, 1]} : vector<392x32xf32> to vector<8x32xf32>
    %92 = vector.extract_strided_slice %8 {offsets = [240, 0], sizes = [8, 32], strides = [1, 1]} : vector<392x32xf32> to vector<8x32xf32>
    %93 = vector.extract_strided_slice %8 {offsets = [256, 0], sizes = [8, 32], strides = [1, 1]} : vector<392x32xf32> to vector<8x32xf32>
    %94 = vector.extract_strided_slice %8 {offsets = [272, 0], sizes = [8, 32], strides = [1, 1]} : vector<392x32xf32> to vector<8x32xf32>
    %95 = vector.extract_strided_slice %8 {offsets = [352, 0], sizes = [8, 32], strides = [1, 1]} : vector<392x32xf32> to vector<8x32xf32>
    %96 = vector.extract_strided_slice %8 {offsets = [368, 0], sizes = [8, 32], strides = [1, 1]} : vector<392x32xf32> to vector<8x32xf32>
    %97 = vector.extract_strided_slice %8 {offsets = [384, 0], sizes = [8, 32], strides = [1, 1]} : vector<392x32xf32> to vector<8x32xf32>
    %98 = tpu.concatenate %89, %90, %91, %92, %93, %94, %95, %96, %97 in 0 : vector<8x32xf32>, vector<8x32xf32>, vector<8x32xf32>, vector<8x32xf32>, vector<8x32xf32>, vector<8x32xf32>, vector<8x32xf32>, vector<8x32xf32>, vector<8x32xf32> -> vector<72x32xf32>
    %99 = tpu.concatenate %18, %28, %38, %48, %58, %68, %78, %88, %98 in 1 : vector<72x32xf32>, vector<72x32xf32>, vector<72x32xf32>, vector<72x32xf32>, vector<72x32xf32>, vector<72x32xf32>, vector<72x32xf32>, vector<72x32xf32>, vector<72x32xf32> -> vector<72x288xf32>
    %c0_7 = arith.constant 0 : index
    %c0_8 = arith.constant 0 : index
    %100 = vector.load %arg3[%c0_7, %c0_8] : memref<288x32xf32, #tpu.memory_space<vmem>>, vector<288x32xf32>
    %cst_9 = arith.constant dense<0.000000e+00> : vector<72x32xf32>
    %101 = tpu.matmul %99, %100, %cst_9 {dimension_numbers = #tpu.dot_dimension_numbers<[1], [0], [0], [1], [0, 0, 1, 1], [], []>} : vector<72x288xf32>, vector<288x32xf32>, vector<72x32xf32> -> vector<72x32xf32>
    %c1 = arith.constant 1 : index
    %c0_10 = arith.constant 0 : index
    %102 = vector.load %arg6[%c1, %c0_10] : memref<2x32xf32, #tpu.memory_space<vmem>>, vector<1x32xf32>
    %103 = vector.broadcast %102 : vector<1x32xf32> to vector<72x32xf32>
    %104 = arith.addf %101, %103 : vector<72x32xf32>
    %cst_11 = arith.constant 0.000000e+00 : f32
    %105 = vector.broadcast %cst_11 : f32 to vector<72x32xf32>
    %106 = arith.maximumf %104, %105 : vector<72x32xf32>
    %107 = vector.extract_strided_slice %106 {offsets = [0, 0], sizes = [8, 32], strides = [1, 1]} : vector<72x32xf32> to vector<8x32xf32>
    %108 = vector.extract_strided_slice %106 {offsets = [8, 0], sizes = [8, 32], strides = [1, 1]} : vector<72x32xf32> to vector<8x32xf32>
    %109 = vector.extract_strided_slice %106 {offsets = [16, 0], sizes = [8, 32], strides = [1, 1]} : vector<72x32xf32> to vector<8x32xf32>
    %110 = vector.extract_strided_slice %106 {offsets = [24, 0], sizes = [8, 32], strides = [1, 1]} : vector<72x32xf32> to vector<8x32xf32>
    %111 = vector.extract_strided_slice %106 {offsets = [32, 0], sizes = [8, 32], strides = [1, 1]} : vector<72x32xf32> to vector<8x32xf32>
    %112 = vector.extract_strided_slice %106 {offsets = [40, 0], sizes = [8, 32], strides = [1, 1]} : vector<72x32xf32> to vector<8x32xf32>
    %113 = vector.extract_strided_slice %106 {offsets = [48, 0], sizes = [8, 32], strides = [1, 1]} : vector<72x32xf32> to vector<8x32xf32>
    %114 = vector.extract_strided_slice %106 {offsets = [56, 0], sizes = [8, 32], strides = [1, 1]} : vector<72x32xf32> to vector<8x32xf32>
    %115 = vector.extract_strided_slice %106 {offsets = [64, 0], sizes = [8, 32], strides = [1, 1]} : vector<72x32xf32> to vector<8x32xf32>
    %116 = tpu.concatenate %107, %108, %109, %110, %111, %112, %113, %114, %115 in 1 : vector<8x32xf32>, vector<8x32xf32>, vector<8x32xf32>, vector<8x32xf32>, vector<8x32xf32>, vector<8x32xf32>, vector<8x32xf32>, vector<8x32xf32>, vector<8x32xf32> -> vector<8x288xf32>
    %c0_12 = arith.constant 0 : index
    %c0_13 = arith.constant 0 : index
    %117 = vector.load %arg4[%c0_12, %c0_13] : memref<288x50xf32, #tpu.memory_space<vmem>>, vector<288x50xf32>
    %cst_14 = arith.constant dense<0.000000e+00> : vector<8x50xf32>
    %118 = tpu.matmul %116, %117, %cst_14 {dimension_numbers = #tpu.dot_dimension_numbers<[1], [0], [0], [1], [0, 0, 1, 1], [], []>} : vector<8x288xf32>, vector<288x50xf32>, vector<8x50xf32> -> vector<8x50xf32>
    %c0_15 = arith.constant 0 : index
    %c0_16 = arith.constant 0 : index
    %119 = vector.load %arg7[%c0_15, %c0_16] : memref<3x50xf32, #tpu.memory_space<vmem>>, vector<1x50xf32>
    %120 = vector.broadcast %119 : vector<1x50xf32> to vector<8x50xf32>
    %121 = arith.addf %118, %120 : vector<8x50xf32>
    %cst_17 = arith.constant dense<0.000000e+00> : vector<8xf32>
    %122 = vector.multi_reduction <add>, %121, %cst_17 [1] : vector<8x50xf32> to vector<8xf32>
    %123 = vector.shape_cast %122 : vector<8xf32> to vector<8x1xf32>
    %cst_18 = arith.constant 5.000000e+01 : f32
    %124 = vector.broadcast %cst_18 : f32 to vector<8x1xf32>
    %125 = arith.divf %123, %124 : vector<8x1xf32>
    %126 = vector.broadcast %125 : vector<8x1xf32> to vector<8x50xf32>
    %127 = arith.subf %121, %126 : vector<8x50xf32>
    %128 = arith.mulf %127, %127 : vector<8x50xf32>
    %cst_19 = arith.constant dense<0.000000e+00> : vector<8xf32>
    %129 = vector.multi_reduction <add>, %128, %cst_19 [1] : vector<8x50xf32> to vector<8xf32>
    %130 = vector.shape_cast %129 : vector<8xf32> to vector<8x1xf32>
    %cst_20 = arith.constant 5.000000e+01 : f32
    %131 = vector.broadcast %cst_20 : f32 to vector<8x1xf32>
    %132 = arith.divf %130, %131 : vector<8x1xf32>
    %133 = vector.broadcast %125 : vector<8x1xf32> to vector<8x50xf32>
    %134 = arith.subf %121, %133 : vector<8x50xf32>
    %cst_21 = arith.constant 9.99999974E-6 : f32
    %135 = vector.broadcast %cst_21 : f32 to vector<8x1xf32>
    %136 = arith.addf %132, %135 : vector<8x1xf32>
    %137 = math.rsqrt %136 : vector<8x1xf32>
    %138 = vector.broadcast %137 : vector<8x1xf32> to vector<8x50xf32>
    %139 = arith.mulf %134, %138 : vector<8x50xf32>
    %c1_22 = arith.constant 1 : index
    %c0_23 = arith.constant 0 : index
    %140 = vector.load %arg7[%c1_22, %c0_23] : memref<3x50xf32, #tpu.memory_space<vmem>>, vector<1x50xf32>
    %141 = vector.broadcast %140 : vector<1x50xf32> to vector<8x50xf32>
    %142 = arith.mulf %139, %141 : vector<8x50xf32>
    %c2 = arith.constant 2 : index
    %c0_24 = arith.constant 0 : index
    %143 = vector.load %arg7[%c2, %c0_24] : memref<3x50xf32, #tpu.memory_space<vmem>>, vector<1x50xf32>
    %144 = vector.broadcast %143 : vector<1x50xf32> to vector<8x50xf32>
    %145 = arith.addf %142, %144 : vector<8x50xf32>
    %146 = math.tanh %145 : vector<8x50xf32>
    %c0_25 = arith.constant 0 : index
    %c0_26 = arith.constant 0 : index
    %147 = vector.load %arg5[%c0_25, %c0_26] : memref<50x7xf32, #tpu.memory_space<vmem>>, vector<50x7xf32>
    %cst_27 = arith.constant dense<0.000000e+00> : vector<8x7xf32>
    %148 = tpu.matmul %146, %147, %cst_27 {dimension_numbers = #tpu.dot_dimension_numbers<[1], [0], [0], [1], [0, 0, 1, 1], [], []>} : vector<8x50xf32>, vector<50x7xf32>, vector<8x7xf32> -> vector<8x7xf32>
    %c0_28 = arith.constant 0 : index
    %c0_29 = arith.constant 0 : index
    %149 = vector.load %arg8[%c0_28, %c0_29] : memref<1x7xf32, #tpu.memory_space<vmem>>, vector<1x7xf32>
    %150 = vector.broadcast %149 : vector<1x7xf32> to vector<8x7xf32>
    %151 = arith.addf %148, %150 : vector<8x7xf32>
    %cst_30 = arith.constant 0.000000e+00 : f32
    %152 = vector.broadcast %cst_30 : f32 to vector<8x71xf32>
    %153 = tpu.concatenate %146, %151, %152 in 1 : vector<8x50xf32>, vector<8x7xf32>, vector<8x71xf32> -> vector<8x128xf32>
    %c0_31 = arith.constant 0 : index
    %c0_32 = arith.constant 0 : index
    %154 = vector.load %arg9[%c0_31, %c0_32] : memref<8x128xf32, #tpu.memory_space<vmem>>, vector<8x128xf32>
    tpu.vector_store %arg9[%c0_31, %c0_32], %153 {strides = array<i32>} : memref<8x128xf32, #tpu.memory_space<vmem>>, vector<8x128xf32>,
    return
  }
  func.func @transform_0(%arg0: i32) -> (i32, i32, i32) {
    %c0_i32 = arith.constant 0 : i32
    %c0_i32_0 = arith.constant 0 : i32
    %c0_i32_1 = arith.constant 0 : i32
    return %c0_i32, %arg0, %c0_i32_0 : i32, i32, i32
  }
  func.func @transform_1(%arg0: i32) -> (i32, i32) {
    %c0_i32 = arith.constant 0 : i32
    %c0_i32_0 = arith.constant 0 : i32
    %c0_i32_1 = arith.constant 0 : i32
    return %c0_i32, %c0_i32_0 : i32, i32
  }
  func.func @transform_2(%arg0: i32) -> (i32, i32) {
    %c0_i32 = arith.constant 0 : i32
    %c0_i32_0 = arith.constant 0 : i32
    %c0_i32_1 = arith.constant 0 : i32
    return %c0_i32, %c0_i32_0 : i32, i32
  }
  func.func @transform_3(%arg0: i32) -> (i32, i32) {
    %c0_i32 = arith.constant 0 : i32
    %c0_i32_0 = arith.constant 0 : i32
    %c0_i32_1 = arith.constant 0 : i32
    return %c0_i32, %c0_i32_0 : i32, i32
  }
  func.func @transform_4(%arg0: i32) -> (i32, i32) {
    %c0_i32 = arith.constant 0 : i32
    %c0_i32_0 = arith.constant 0 : i32
    %c0_i32_1 = arith.constant 0 : i32
    return %c0_i32, %c0_i32_0 : i32, i32
  }
  func.func @transform_5(%arg0: i32) -> (i32, i32) {
    %c0_i32 = arith.constant 0 : i32
    %c0_i32_0 = arith.constant 0 : i32
    %c0_i32_1 = arith.constant 0 : i32
    return %c0_i32, %c0_i32_0 : i32, i32
  }
  func.func @transform_6(%arg0: i32) -> (i32, i32) {
    %c0_i32 = arith.constant 0 : i32
    %c0_i32_0 = arith.constant 0 : i32
    %c0_i32_1 = arith.constant 0 : i32
    return %c0_i32, %c0_i32_0 : i32, i32
  }
  func.func @transform_7(%arg0: i32) -> (i32, i32) {
    %c0_i32 = arith.constant 0 : i32
    %c0_i32_0 = arith.constant 0 : i32
    %c0_i32_1 = arith.constant 0 : i32
    return %c0_i32, %c0_i32_0 : i32, i32
  }
  func.func @transform_8(%arg0: i32) -> (i32, i32) {
    %c0_i32 = arith.constant 0 : i32
    %c0_i32_0 = arith.constant 0 : i32
    return %arg0, %c0_i32 : i32, i32
  }
}

</mosaic_0001>

<bundles_post_ra>
// kernel: forward.1
= control target key start
LH: loop header
LB: loop body
LE: loop exit
PB: predicated region body
PF: predicated region fallthrough
CT: control target
= control target key end

     0   :  { %v2188_v0 = vmov 0.0|0.0   ;;  %vm2189_vm0 = vmmov 0   ;;  %v2190_v4 = vmov 0.0   ;;  %vm236_vm1 = vcmask 1043456   ;;  %s2191_s15 = smov 32   ;;  %s2192_s17 = smov 64   ;;  %s3200_s1 = inlined_call_operand.vmem [shape: f32[36,32], index: 1, kind: input, shape index: {}]   ;;  %s3201_s0 = inlined_call_operand.vmem [shape: f32[49,8,36], index: 0, kind: input, shape index: {}]   ;;  %s3202_s2 = inlined_call_operand.vmem [shape: f32[288,32], index: 2, kind: input, shape index: {}]   ;;  %s3203_s5 = inlined_call_operand.vmem [shape: f32[2,32], index: 5, kind: input, shape index: {}]   ;;  %s3204_s3 = inlined_call_operand.vmem [shape: f32[288,50], index: 3, kind: input, shape index: {}]   ;;  %s3205_s6 = inlined_call_operand.vmem [shape: f32[3,50], index: 6, kind: input, shape index: {}]   ;;  %s3206_s4 = inlined_call_operand.vmem [shape: f32[50,7], index: 4, kind: input, shape index: {}]   ;;  %s3207_s7 = inlined_call_operand.vmem [shape: f32[1,7], index: 7, kind: input, shape index: {}]   ;;  %s3208_s8 = inlined_call_operand.vmem [shape: f32[8,128], index: 8, kind: output, shape index: {}]  }
   0x1   :  { %1940 = vmatprep.subr.bf16.mxu0 %v2188_v0  ;;  %v78_v1 = vld [vmem:[%s3200_s1] sm:$0xff]  ;;  %v79_v2 = vld [vmem:[%s3200_s1 + $0x8] sm:$0xff]  ;;  %v80_v3 = vld [vmem:[%s3200_s1 + $0x10] sm:$0xff]  ;;  %1730 = vmatprep.mubr.msk.f32.mxu0 %vm2189_vm0, %v2190_v4  ;;  %vm88_vm2 = vcmask 293888   ;;  %s2193_s18 = smov 96   ;;  %vm787_vm3 = vcmask 261120  }
   0x2   :  { %v1941_v5 = vpack.c.bf16 %v79_v2, %v78_v1  ;;  %v81_v6 = vld [vmem:[%s3200_s1 + $0x18] sm:$0xff]  ;;  %2031 = vmatprep.subr.bf16.mxu1 %v2188_v0  ;;  %1841 = vmatprep.mubr.msk.f32.mxu1 %vm2189_vm0, %v2190_v4  ;;  %v82_v8 = vld [vmem:[%s3200_s1 + $0x20] sm:$0xf]  ;;  %v66_v10 = vld [vmem:[%s3201_s0 + $0x128] sm:$0xff]  ;;  %vm797_vm4 = vcmask 523264   ;;  %vm807_vm5 = vcmask 785408  }
   0x3   :  { %v1944_v7 = vpack.c.bf16 %v81_v6, %v80_v3  ;;  %v29_v9 = vld [vmem:[%s3201_s0] sm:$0xff]  ;;  %v30_v11 = vld [vmem:[%s3201_s0 + $0x8] sm:$0xff]  ;;  %v67_v12 = vld [vmem:[%s3201_s0 + $0x130] sm:$0xff]  ;;  %vm1347_vm6 = vcmask 408576   ;;  %vm1392_vm7 = vcmask 1041408   ;;  %vm1471_vm8 = vcmask 465920  }
   0x4   :  { %1942 = vmatpush3.bf16.msra.mxu0 %v1941_v5  ;;  %2034 = vmatpush3.bf16.msra.mxu1 %v1941_v5  ;;  %v31_v13 = vld [vmem:[%s3201_s0 + $0x10] sm:$0xff]  ;;  %v68_v14 = vld [vmem:[%s3201_s0 + $0x138] sm:$0xff]  ;;  %v69_v16 = vld [vmem:[%s3201_s0 + $0x140] sm:$0xff] }
   0x5   :  { %1943 = vmatprep.subr.bf16.mxu0 %v2188_v0  ;;  %2032 = vmatprep.subr.bf16.mxu1 %v2188_v0  ;;  %v32_v15 = vld [vmem:[%s3201_s0 + $0x18] sm:$0xff]  ;;  %v33_v17 = vld [vmem:[%s3201_s0 + $0x20] sm:$0xff]  ;;  %v70_v18 = vld [vmem:[%s3201_s0 + $0x148] sm:$0xff] }
   0x6   :  { %v34_v19 = vld [vmem:[%s3201_s0 + $0x28] sm:$0xff]  ;;  %v71_v20 = vld [vmem:[%s3201_s0 + $0x150] sm:$0xff]  ;;  %v72_v22 = vld [vmem:[%s3201_s0 + $0x158] sm:$0xff] }
   0x7   :  { %v35_v21 = vld [vmem:[%s3201_s0 + $0x30] sm:$0xff]  ;;  %v36_v23 = vld [vmem:[%s3201_s0 + $0x38] sm:$0xff]  ;;  %v73_v24 = vld [vmem:[%s3201_s0 + $0x160] sm:$0xff] }
   0x8   :  { %1945 = vmatpush3.bf16.msra.mxu0 %v1944_v7  ;;  %2035 = vmatpush3.bf16.msra.mxu1 %v1944_v7  ;;  %v37_v25 = vld [vmem:[%s3201_s0 + $0x40] sm:$0xff]  ;;  %v74_v26 = vld [vmem:[%s3201_s0 + $0x168] sm:$0xff]  ;;  %v75_v28 = vld [vmem:[%s3201_s0 + $0x170] sm:$0xff] }
   0x9   :  { %1728 = vmatprep.subr.mxu0 %v2190_v4  ;;  %2033 = vmatprep.subr.mxu1 %v2190_v4  ;;  %v38_v27 = vld [vmem:[%s3201_s0 + $0x48] sm:$0xff]  ;;  %v39_v29 = vld [vmem:[%s3201_s0 + $0x50] sm:$0xff]  ;;  %v76_v30 = vld [vmem:[%s3201_s0 + $0x178] sm:$0xff] }
   0xa   :  { %v40_v31 = vld [vmem:[%s3201_s0 + $0x58] sm:$0xff]  ;;  %v41_v32 = vld [vmem:[%s3201_s0 + $0x60] sm:$0xff]  ;;  %v42_v33 = vld [vmem:[%s3201_s0 + $0x68] sm:$0xff] }
   0xb   :  { %v43_v34 = vld [vmem:[%s3201_s0 + $0x70] sm:$0xff]  ;;  %v44_v35 = vld [vmem:[%s3201_s0 + $0x78] sm:$0xff]  ;;  %v45_v36 = vld [vmem:[%s3201_s0 + $0x80] sm:$0xff] }
   0xc   :  { %1729 = vmatpush3.msk.msra.mxu0 %vm236_vm1, %v82_v8  ;;  %2036 = vmatpush3.msk.msra.mxu1 %vm236_vm1, %v82_v8  ;;  %v46_v37 = vld [vmem:[%s3201_s0 + $0x88] sm:$0xff]  ;;  %v47_v38 = vld [vmem:[%s3201_s0 + $0x90] sm:$0xff]  ;;  %v48_v39 = vld [vmem:[%s3201_s0 + $0x98] sm:$0xff] }
   0xd   :  { %1731 = vmatmul.mubr.msk.f32.vlgmr.msra.gmra.mrb[0].mxu0 %vm88_vm2, %v29_v9  ;;  %1842 = vmatmul.mubr.msk.f32.vlgmr.msra.gmra.mrb[0].mxu1 %vm88_vm2, %v66_v10  ;;  %v49_v40 = vld [vmem:[%s3201_s0 + $0xa0] sm:$0xff]  ;;  %v50_v41 = vld [vmem:[%s3201_s0 + $0xa8] sm:$0xff]  ;;  %v51_v42 = vld [vmem:[%s3201_s0 + $0xb0] sm:$0xff] }
   0xe   :  { %1733 = vmatprep.mubr.msk.f32.mxu0 %vm2189_vm0, %v2190_v4  ;;  %1844 = vmatprep.mubr.msk.f32.mxu1 %vm2189_vm0, %v2190_v4  ;;  %v52_v43 = vld [vmem:[%s3201_s0 + $0xb8] sm:$0xff]  ;;  %v53_v44 = vld [vmem:[%s3201_s0 + $0xc0] sm:$0xff]  ;;  %v54_v45 = vld [vmem:[%s3201_s0 + $0xc8] sm:$0xff] }
   0xf   :  { %v55_v46 = vld [vmem:[%s3201_s0 + $0xd0] sm:$0xff]  ;;  %v56_v47 = vld [vmem:[%s3201_s0 + $0xd8] sm:$0xff]  ;;  %v57_v48 = vld [vmem:[%s3201_s0 + $0xe0] sm:$0xff] }
  0x10   :  { %v58_v49 = vld [vmem:[%s3201_s0 + $0xe8] sm:$0xff]  ;;  %v59_v50 = vld [vmem:[%s3201_s0 + $0xf0] sm:$0xff]  ;;  %v60_v51 = vld [vmem:[%s3201_s0 + $0xf8] sm:$0xff] }
  0x11   :  { %1734 = vmatmul.mubr.msk.f32.gmra.mrb[2].mxu0 %vm88_vm2, %v30_v11  ;;  %1845 = vmatmul.mubr.msk.f32.gmra.mrb[2].mxu1 %vm88_vm2, %v67_v12  ;;  %v61_v52 = vld [vmem:[%s3201_s0 + $0x100] sm:$0xff]  ;;  %v62_v53 = vld [vmem:[%s3201_s0 + $0x108] sm:$0xff]  ;;  %v63_v54 = vld [vmem:[%s3201_s0 + $0x110] sm:$0xff] }
  0x12   :  { %1736 = vmatprep.mubr.msk.f32.mxu0 %vm2189_vm0, %v2190_v4  ;;  %1847 = vmatprep.mubr.msk.f32.mxu1 %vm2189_vm0, %v2190_v4  ;;  %v64_v55 = vld [vmem:[%s3201_s0 + $0x118] sm:$0xff]  ;;  %v65_v56 = vld [vmem:[%s3201_s0 + $0x120] sm:$0xff] }
  0x13   :  { %v77_v57 = vld [vmem:[%s3201_s0 + $0x180] sm:$0xff] }
  0x15   :  { %1737 = vmatmul.mubr.msk.f32.gmra.mrb[4].mxu0 %vm88_vm2, %v31_v13  ;;  %1848 = vmatmul.mubr.msk.f32.gmra.mrb[4].mxu1 %vm88_vm2, %v68_v14 }
  0x16   :  { %1739 = vmatprep.mubr.msk.f32.mxu0 %vm2189_vm0, %v2190_v4  ;;  %1850 = vmatprep.mubr.msk.f32.mxu1 %vm2189_vm0, %v2190_v4 }
  0x19   :  { %1740 = vmatmul.mubr.msk.f32.gmra.mrb[6].mxu0 %vm88_vm2, %v32_v15  ;;  %1851 = vmatmul.mubr.msk.f32.gmra.mrb[6].mxu1 %vm88_vm2, %v69_v16 }
  0x1a   :  { %1742 = vmatprep.mubr.msk.f32.mxu0 %vm2189_vm0, %v2190_v4  ;;  %1853 = vmatprep.mubr.msk.f32.mxu1 %vm2189_vm0, %v2190_v4 }
  0x1d   :  { %1743 = vmatmul.mubr.msk.f32.gmra.mrb[8].mxu0 %vm88_vm2, %v33_v17  ;;  %1854 = vmatmul.mubr.msk.f32.gmra.mrb[8].mxu1 %vm88_vm2, %v70_v18 }
  0x1e   :  { %1745 = vmatprep.mubr.msk.f32.mxu0 %vm2189_vm0, %v2190_v4  ;;  %1856 = vmatprep.mubr.msk.f32.mxu1 %vm2189_vm0, %v2190_v4 }
  0x21   :  { %1746 = vmatmul.mubr.msk.f32.gmra.mrb[10].mxu0 %vm88_vm2, %v34_v19  ;;  %1857 = vmatmul.mubr.msk.f32.gmra.mrb[10].mxu1 %vm88_vm2, %v71_v20  ;;  %v860_v20 = vld [vmem:[%s3202_s2 + $0x80] sm:$0xff] }
  0x22   :  { %1748 = vmatprep.mubr.msk.f32.mxu0 %vm2189_vm0, %v2190_v4  ;;  %1859 = vmatprep.mubr.msk.f32.mxu1 %vm2189_vm0, %v2190_v4 }
  0x25   :  { %1749 = vmatmul.mubr.msk.f32.gmra.mrb[12].mxu0 %vm88_vm2, %v35_v21  ;;  %1860 = vmatmul.mubr.msk.f32.gmra.mrb[12].mxu1 %vm88_vm2, %v72_v22  ;;  %v861_v21 = vld [vmem:[%s3202_s2 + $0x88] sm:$0xff]  ;;  %v844_v22 = vld [vmem:[%s3202_s2] sm:$0xff] }
  0x26   :  { %1751 = vmatprep.mubr.msk.f32.mxu0 %vm2189_vm0, %v2190_v4  ;;  %1862 = vmatprep.mubr.msk.f32.mxu1 %vm2189_vm0, %v2190_v4 }
  0x29   :  { %1752 = vmatmul.mubr.msk.f32.gmra.mrb[14].mxu0 %vm88_vm2, %v36_v23  ;;  %1863 = vmatmul.mubr.msk.f32.gmra.mrb[14].mxu1 %vm88_vm2, %v73_v24 }
  0x2a   :  { %1754 = vmatprep.mubr.msk.f32.mxu0 %vm2189_vm0, %v2190_v4  ;;  %1865 = vmatprep.mubr.msk.f32.mxu1 %vm2189_vm0, %v2190_v4 }
  0x2d   :  { %1755 = vmatmul.mubr.msk.f32.gmra.mrb[16].mxu0 %vm88_vm2, %v37_v25  ;;  %1866 = vmatmul.mubr.msk.f32.gmra.mrb[16].mxu1 %vm88_vm2, %v74_v26  ;;  %v1946_v25 = vpack.c.bf16 %v861_v21, %v860_v20  ;;  %v845_v26 = vld [vmem:[%s3202_s2 + $0x8] sm:$0xff] }
  0x2e   :  { %1757 = vmatprep.mubr.msk.f32.mxu0 %vm2189_vm0, %v2190_v4  ;;  %1868 = vmatprep.mubr.msk.f32.mxu1 %vm2189_vm0, %v2190_v4 }
  0x2f   :  { %1947 = vmatprep.subr.bf16.mxu1 %v1946_v25 }
  0x31   :  { %1758 = vmatmul.mubr.msk.f32.gmra.mrb[18].mxu0 %vm88_vm2, %v38_v27  ;;  %1869 = vmatmul.mubr.msk.f32.gmra.mrb[18].mxu1 %vm88_vm2, %v75_v28 }
  0x32   :  { %1760 = vmatprep.mubr.msk.f32.mxu0 %vm2189_vm0, %v2190_v4  ;;  %1871 = vmatprep.mubr.msk.f32.mxu1 %vm2189_vm0, %v2190_v4 }
  0x35   :  { %1761 = vmatmul.mubr.msk.f32.gmra.mrb[20].mxu0 %vm88_vm2, %v39_v29  ;;  %1872 = vmatmul.mubr.msk.f32.gmra.mrb[20].mxu1 %vm88_vm2, %v76_v30  ;;  %v1948_v29 = vpack.c.bf16 %v845_v26, %v844_v22  ;;  %v862_v30 = vld [vmem:[%s3202_s2 + $0x90] sm:$0xff]  ;;  %v853_v22 = vld [vmem:[%s3202_s2 + $0x48] sm:$0xff] }
  0x36   :  { %1763 = vmatprep.mubr.msk.f32.mxu0 %vm2189_vm0, %v2190_v4  ;;  %1874 = vmatprep.mubr.msk.f32.mxu1 %vm2189_vm0, %v2190_v4 }
  0x37   :  { %1949 = vmatpush3.bf16.msra.mxu1 %v1948_v29 }
  0x39   :  { %1764 = vmatmul.mubr.msk.f32.gmra.mrb[22].mxu0 %vm88_vm2, %v40_v31  ;;  %1875 = vmatmul.mubr.msk.f32.gmra.mrb[22].mxu1 %vm88_vm2, %v77_v57  ;;  %v863_v31 = vld [vmem:[%s3202_s2 + $0x98] sm:$0xff] }
  0x3a   :  { %1766 = vmatprep.mubr.msk.f32.mxu0 %vm2189_vm0, %v2190_v4  ;;  %v867_v57 = vld [vmem:[%s3202_s2 + $0xb8] sm:$0xff] }
  0x3d   :  { %1767 = vmatmul.mubr.msk.f32.gmra.mrb[24].mxu0 %vm88_vm2, %v41_v32  ;;  %v2600_v32 = vld [vmem:[%s3203_s5] ss:$0 sm:$0xff] }
  0x3e   :  { %1769 = vmatprep.mubr.msk.f32.mxu0 %vm2189_vm0, %v2190_v4 }
  0x41   :  { %1770 = vmatmul.mubr.msk.f32.gmra.mrb[26].mxu0 %vm88_vm2, %v42_v33 }
  0x42   :  { %1772 = vmatprep.mubr.msk.f32.mxu0 %vm2189_vm0, %v2190_v4 }
  0x45   :  { %1773 = vmatmul.mubr.msk.f32.gmra.mrb[28].mxu0 %vm88_vm2, %v43_v34 }
  0x46   :  { %1775 = vmatprep.mubr.msk.f32.mxu0 %vm2189_vm0, %v2190_v4 }
  0x49   :  { %1776 = vmatmul.mubr.msk.f32.gmra.mrb[30].mxu0 %vm88_vm2, %v44_v35  ;;  %v1950_v35 = vpack.c.bf16 %v863_v31, %v862_v30 }
  0x4a   :  { %1778 = vmatprep.mubr.msk.f32.mxu0 %vm2189_vm0, %v2190_v4 }
  0x4b   :  { %1951 = vmatprep.subr.bf16.mxu1 %v1950_v35 }
  0x4d   :  { %1779 = vmatmul.mubr.msk.f32.gmra.mrb[32].mxu0 %vm88_vm2, %v45_v36  ;;  %v846_v36 = vld [vmem:[%s3202_s2 + $0x10] sm:$0xff] }
  0x4e   :  { %1781 = vmatprep.mubr.msk.f32.mxu0 %vm2189_vm0, %v2190_v4 }
  0x51   :  { %1782 = vmatmul.mubr.msk.f32.gmra.mrb[34].mxu0 %vm88_vm2, %v46_v37  ;;  %v847_v37 = vld [vmem:[%s3202_s2 + $0x18] sm:$0xff] }
  0x52   :  { %1784 = vmatprep.mubr.msk.f32.mxu0 %vm2189_vm0, %v2190_v4 }
  0x55   :  { %1785 = vmatmul.mubr.msk.f32.gmra.mrb[36].mxu0 %vm88_vm2, %v47_v38 }
  0x56   :  { %1787 = vmatprep.mubr.msk.f32.mxu0 %vm2189_vm0, %v2190_v4 }
  0x59   :  { %1788 = vmatmul.mubr.msk.f32.gmra.mrb[38].mxu0 %vm88_vm2, %v48_v39 }
  0x5a   :  { %1790 = vmatprep.mubr.msk.f32.mxu0 %vm2189_vm0, %v2190_v4 }
  0x5d   :  { %1791 = vmatmul.mubr.msk.f32.gmra.mrb[40].mxu0 %vm88_vm2, %v49_v40 }
  0x5e   :  { %1793 = vmatprep.mubr.msk.f32.mxu0 %vm2189_vm0, %v2190_v4 }
  0x61   :  { %1794 = vmatmul.mubr.msk.f32.gmra.mrb[42].mxu0 %vm88_vm2, %v50_v41  ;;  %v1952_v41 = vpack.c.bf16 %v847_v37, %v846_v36 }
  0x62   :  { %1796 = vmatprep.mubr.msk.f32.mxu0 %vm2189_vm0, %v2190_v4 }
  0x63   :  { %1953 = vmatpush3.bf16.msra.mxu1 %v1952_v41 }
  0x65   :  { %1797 = vmatmul.mubr.msk.f32.gmra.mrb[44].mxu0 %vm88_vm2, %v51_v42  ;;  %v864_v42 = vld [vmem:[%s3202_s2 + $0xa0] sm:$0xff] }
  0x66   :  { %1799 = vmatprep.mubr.msk.f32.mxu0 %vm2189_vm0, %v2190_v4 }
  0x69   :  { %1800 = vmatmul.mubr.msk.f32.gmra.mrb[46].mxu0 %vm88_vm2, %v52_v43  ;;  %v865_v43 = vld [vmem:[%s3202_s2 + $0xa8] sm:$0xff] }
  0x6a   :  { %1802 = vmatprep.mubr.msk.f32.mxu0 %vm2189_vm0, %v2190_v4 }
  0x6d   :  { %1803 = vmatmul.mubr.msk.f32.gmra.mrb[48].mxu0 %vm88_vm2, %v53_v44 }
  0x6e   :  { %1805 = vmatprep.mubr.msk.f32.mxu0 %vm2189_vm0, %v2190_v4 }
  0x71   :  { %1806 = vmatmul.mubr.msk.f32.gmra.mrb[50].mxu0 %vm88_vm2, %v54_v45 }
  0x72   :  { %1808 = vmatprep.mubr.msk.f32.mxu0 %vm2189_vm0, %v2190_v4 }
  0x75   :  { %1809 = vmatmul.mubr.msk.f32.gmra.mrb[52].mxu0 %vm88_vm2, %v55_v46  ;;  %v1954_v46 = vpack.c.bf16 %v865_v43, %v864_v42  ;;  %v854_v43 = vld [vmem:[%s3202_s2 + $0x50] sm:$0xff] }
  0x76   :  { %1811 = vmatprep.mubr.msk.f32.mxu0 %vm2189_vm0, %v2190_v4 }
  0x77   :  { %1955 = vmatprep.subr.bf16.mxu1 %v1954_v46 }
  0x79   :  { %1812 = vmatmul.mubr.msk.f32.gmra.mrb[54].mxu0 %vm88_vm2, %v56_v47  ;;  %v848_v47 = vld [vmem:[%s3202_s2 + $0x20] sm:$0xff] }
  0x7a   :  { %1814 = vmatprep.mubr.msk.f32.mxu0 %vm2189_vm0, %v2190_v4 }
  0x7d   :  { %1815 = vmatmul.mubr.msk.f32.gmra.mrb[56].mxu0 %vm88_vm2, %v57_v48  ;;  %v849_v48 = vld [vmem:[%s3202_s2 + $0x28] sm:$0xff] }
  0x7e   :  { %1817 = vmatprep.mubr.msk.f32.mxu0 %vm2189_vm0, %v2190_v4 }
  0x81   :  { %1818 = vmatmul.mubr.msk.f32.gmra.mrb[58].mxu0 %vm88_vm2, %v58_v49 }
  0x82   :  { %1820 = vmatprep.mubr.msk.f32.mxu0 %vm2189_vm0, %v2190_v4 }
  0x85   :  { %1821 = vmatmul.mubr.msk.f32.gmra.mrb[60].mxu0 %vm88_vm2, %v59_v50 }
  0x86   :  { %1823 = vmatprep.mubr.msk.f32.mxu0 %vm2189_vm0, %v2190_v4 }
  0x89   :  { %1824 = vmatmul.mubr.msk.f32.gmra.mrb[62].mxu0 %vm88_vm2, %v60_v51 }
  0x8a   :  { %1826 = vmatprep.mubr.msk.f32.mxu0 %vm2189_vm0, %v2190_v4 }
  0x8d   :  { %1827 = vmatmul.mubr.msk.f32.gmra.mrb[64].mxu0 %vm88_vm2, %v61_v52 }
  0x8e   :  { %1829 = vmatprep.mubr.msk.f32.mxu0 %vm2189_vm0, %v2190_v4 }
  0x91   :  { %1830 = vmatmul.mubr.msk.f32.gmra.mrb[66].mxu0 %vm88_vm2, %v62_v53  ;;  %v1956_v53 = vpack.c.bf16 %v849_v48, %v848_v47 }
  0x92   :  { %1832 = vmatprep.mubr.msk.f32.mxu0 %vm2189_vm0, %v2190_v4 }
  0x93   :  { %1957 = vmatpush3.bf16.msra.mxu1 %v1956_v53  ;;  %v873_v53 = vld [vmem:[%s3202_s2 + $0xe8] sm:$0xff] }
  0x95   :  { %1833 = vmatmul.mubr.msk.f32.gmra.mrb[68].mxu0 %vm88_vm2, %v63_v54 }
  0x96   :  { %1835 = vmatprep.mubr.msk.f32.mxu0 %vm2189_vm0, %v2190_v4 }
  0x99   :  { %1836 = vmatmul.mubr.msk.f32.gmra.mrb[70].mxu0 %vm88_vm2, %v64_v55 }
  0x9a   :  { %1838 = vmatprep.mubr.msk.f32.mxu0 %vm2189_vm0, %v2190_v4 }
  0x9d   :  { %1839 = vmatmul.mubr.msk.f32.gmra.mrb[72].mxu0 %vm88_vm2, %v65_v56  ;;  %v866_v56 = vld [vmem:[%s3202_s2 + $0xb0] sm:$0xff] }
  0xe0   :  { %v2555_v58 = vpop.f32.mrb[0].mxu0  ;;  %v491_v59 = vpop.f32.mrb[0].mxu1 }
  0xe1   :  { %v1732_v60 = vpop.f32.mrb[1].mxu0  ;;  %v1843_v61 = vpop.f32.mrb[1].mxu1  ;;  %v2613_v39 = vadd.f32 %v2600_v32, %v491_v59 }
  0xe2   :  { %v1958_v61 = vpack.c.bf16 %v867_v57, %v866_v56  ;;  %v856_v56 = vld [vmem:[%s3202_s2 + $0x60] sm:$0xff]  ;;  %v857_v57 = vld [vmem:[%s3202_s2 + $0x68] sm:$0xff] }
  0xe3   :  { %v587_v50 = vmax.f32 %v2613_v39, 0.0 }
  0xe4   :  { %v311_v62 = vpop.f32.mrb[2].mxu0  ;;  %v2557_v63 = vpop.f32.mrb[2].mxu1  ;;  %1959 = vmatprep.subr.bf16.mxu1 %v1958_v61 }
  0xe5   :  { %v1735_v1 = vpop.f32.mrb[3].mxu0  ;;  %v1846_v2 = vpop.f32.mrb[3].mxu1  ;;  %v312_v54 = vadd.f32 %v2600_v32, %v311_v62  ;;  %v851_v62 = vld [vmem:[%s3202_s2 + $0x38] sm:$0xff] }
  0xe6   :  { %v850_v1 = vld [vmem:[%s3202_s2 + $0x30] sm:$0xff] }
  0xe8   :  { %v2559_v3 = vpop.f32.mrb[4].mxu0  ;;  %v2561_v5 = vpop.f32.mrb[4].mxu1 }
  0xe9   :  { %v1738_v6 = vpop.f32.mrb[5].mxu0  ;;  %v1849_v7 = vpop.f32.mrb[5].mxu1 }
  0xea   :  { %v2651_v7 = vadd.f32 %v2600_v32, %v2561_v5  ;;  %v852_v5 = vld [vmem:[%s3202_s2 + $0x40] sm:$0xff] }
  0xec   :  { %v2563_v8 = vpop.f32.mrb[6].mxu0  ;;  %v2565_v9 = vpop.f32.mrb[6].mxu1  ;;  %v589_v30 = vmax.f32 %v2651_v7, 0.0 }
  0xed   :  { %v1741_v10 = vpop.f32.mrb[7].mxu0  ;;  %v1852_v11 = vpop.f32.mrb[7].mxu1  ;;  %v322_v36 = vadd.f32 %v2600_v32, %v2563_v8  ;;  %v855_v8 = vld [vmem:[%s3202_s2 + $0x58] sm:$0xff] }
  0xee   :  { %v1968_v48 = vpack.c.bf16 %v855_v8, %v854_v43 }
  0xf0   :  { %v2567_v12 = vpop.f32.mrb[8].mxu0  ;;  %v2569_v13 = vpop.f32.mrb[8].mxu1 }
  0xf1   :  { %v1744_v14 = vpop.f32.mrb[9].mxu0  ;;  %v1855_v15 = vpop.f32.mrb[9].mxu1  ;;  %v2751_v43 = vadd.f32 %v2600_v32, %v2567_v12 }
  0xf2   :  { %v1960_v14 = vpack.c.bf16 %v851_v62, %v850_v1  ;;  %v868_v15 = vld [vmem:[%s3202_s2 + $0xc0] sm:$0xff]  ;;  %v1972_v1 = vpack.c.bf16 %v857_v57, %v856_v56 }
  0xf4   :  { %v2571_v16 = vpop.f32.mrb[10].mxu0  ;;  %v2573_v17 = vpop.f32.mrb[10].mxu1  ;;  %1961 = vmatpush3.bf16.msra.mxu1 %v1960_v14 }
  0xf5   :  { %v1747_v18 = vpop.f32.mrb[11].mxu0  ;;  %v1858_v19 = vpop.f32.mrb[11].mxu1  ;;  %v332_v62 = vadd.f32 %v2600_v32, %v2571_v16  ;;  %v859_v16 = vld [vmem:[%s3202_s2 + $0x78] sm:$0xff] }
  0xf6   :  { %v869_v18 = vld [vmem:[%s3202_s2 + $0xc8] sm:$0xff]  ;;  %v551_v19 = vmax.f32 %v312_v54, 0.0 }
  0xf7   :  { %v1962_v21 = vpack.c.bf16 %v869_v18, %v868_v15  ;;  %v858_v18 = vld [vmem:[%s3202_s2 + $0x70] sm:$0xff] }
  0xf8   :  { %v2584_v23 = vpop.f32.mrb[12].mxu0  ;;  %v2586_v24 = vpop.f32.mrb[12].mxu1 }
  0xf9   :  { %v1750_v27 = vpop.f32.mrb[13].mxu0  ;;  %v1861_v28 = vpop.f32.mrb[13].mxu1  ;;  %1963 = vmatprep.subr.bf16.mxu1 %v1962_v21  ;;  %v1976_v21 = vpack.c.bf16 %v859_v16, %v858_v18 }
  0xfa   :  { %v1964_v27 = vpack.c.bf16 %v853_v22, %v852_v5  ;;  %v2733_v22 = vadd.f32 %v2600_v32, %v2559_v3 }
  0xfc   :  { %v2602_v33 = vpop.f32.mrb[14].mxu0  ;;  %v2604_v34 = vpop.f32.mrb[14].mxu1  ;;  %1965 = vmatpush3.bf16.msra.mxu1 %v1964_v27 }
  0xfd   :  { %v1753_v38 = vpop.f32.mrb[15].mxu0  ;;  %v1864_v40 = vpop.f32.mrb[15].mxu1 }
  0xfe   :  { %v870_v38 = vld [vmem:[%s3202_s2 + $0xd0] sm:$0xff]  ;;  %v871_v40 = vld [vmem:[%s3202_s2 + $0xd8] sm:$0xff] }
  0xff   :  { %v1966_v42 = vpack.c.bf16 %v871_v40, %v870_v38 }
 0x100   :  { %v2621_v44 = vpop.f32.mrb[16].mxu0  ;;  %v531_v45 = vpop.f32.mrb[16].mxu1 }
 0x101   :  { %v1756_v49 = vpop.f32.mrb[17].mxu0  ;;  %v532_v51 = vadd.f32 %v2600_v32, %v531_v45  ;;  %v1867_v52 = vpop.f32.mrb[17].mxu1  ;;  %1967 = vmatprep.subr.bf16.mxu1 %v1966_v42 }
 0x102   :  { %v553_v49 = vmax.f32 %v322_v36, 0.0  ;;  %1969 = vmatpush3.bf16.msra.mxu1 %v1968_v48  ;;  %v872_v52 = vld [vmem:[%s3202_s2 + $0xe0] sm:$0xff]  ;;  %v552_v36 = vmax.f32 %v2733_v22, 0.0 }
 0x103   :  { %v595_v55 = vmax.f32 %v532_v51, 0.0 }
 0x104   :  { %v351_v59 = vpop.f32.mrb[18].mxu0  ;;  %v2638_v60 = vpop.f32.mrb[18].mxu1 }
 0x105   :  { %v2647_v2 = vadd.f32 %v2600_v32, %v351_v59  ;;  %v1759_v6 = vpop.f32.mrb[19].mxu0  ;;  %v2655_v10 = vpack.i.bf16 %v587_v50, %v595_v55  ;;  %v1870_v11 = vpop.f32.mrb[19].mxu1  ;;  %v1970_v55 = vpack.c.bf16 %v873_v53, %v872_v52  ;;  %v554_v53 = vmax.f32 %v2751_v43, 0.0 }
 0x106   :  { %v874_v6 = vld [vmem:[%s3202_s2 + $0xf0] sm:$0xff]  ;;  %v875_v11 = vld [vmem:[%s3202_s2 + $0xf8] sm:$0xff] }
 0x107   :  { %v559_v20 = vmax.f32 %v2647_v2, 0.0  ;;  %1971 = vmatprep.subr.bf16.mxu1 %v1970_v55  ;;  %v1974_v15 = vpack.c.bf16 %v875_v11, %v874_v6 }
 0x108   :  { %v2670_v25 = vpop.f32.mrb[20].mxu0  ;;  %v541_v26 = vpop.f32.mrb[20].mxu1  ;;  %1973 = vmatpush3.bf16.msra.mxu1 %v1972_v1 }
 0x109   :  { %v1762_v28 = vpop.f32.mrb[21].mxu0  ;;  %v2044_v29 = vpack.i.bf16 %v551_v19, %v559_v20  ;;  %v542_v31 = vadd.f32 %v2600_v32, %v541_v26  ;;  %v1873_v35 = vpop.f32.mrb[21].mxu1  ;;  %1975 = vmatprep.subr.bf16.mxu1 %v1974_v15  ;;  %v555_v26 = vmax.f32 %v332_v62, 0.0 }
 0x10b   :  { %2045 = vrot.lane.b32.xlu0 %v2044_v29, %s2191_s15  ;;  %v597_v37 = vmax.f32 %v542_v31, 0.0 }
 0x10c   :  { %v361_v41 = vpop.f32.mrb[22].mxu0  ;;  %1977 = vmatpush3.bf16.msra.mxu1 %v1976_v21 }
 0x10d   :  { %v2692_v45 = vadd.f32 %v2600_v32, %v361_v41  ;;  %v1765_v46 = vpop.f32.mrb[23].mxu0  ;;  %v2696_v47 = vpack.i.bf16 %v589_v30, %v597_v37  ;;  %1978 = vmatprep.subr.bf16.mxu1 %v2188_v0  ;;  %v342_v37 = vadd.f32 %v2600_v32, %v2602_v33 }
 0x10f   :  { %v561_v51 = vmax.f32 %v2692_v45, 0.0  ;;  %v557_v8 = vmax.f32 %v342_v37, 0.0 }
 0x110   :  { %v2705_v54 = vpop.f32.mrb[24].mxu0 }
 0x111   :  { %v1768_v59 = vpop.f32.mrb[25].mxu0  ;;  %v2049_v61 = vpack.i.bf16 %v553_v49, %v561_v51 }
 0x113   :  { %2050 = vrot.lane.b32.xlu1 %v2049_v61, %s2191_s15  ;;  %v337_v61 = vadd.f32 %v2600_v32, %v2584_v23 }
 0x114   :  { %v371_v14 = vpop.f32.mrb[26].mxu0 }
 0x115   :  { %v372_v5 = vadd.f32 %v2600_v32, %v371_v14  ;;  %v1771_v19 = vpop.f32.mrb[27].mxu0  ;;  %v556_v15 = vmax.f32 %v337_v61, 0.0 }
 0x117   :  { %v563_v27 = vmax.f32 %v372_v5, 0.0 }
 0x118   :  { %v376_v28 = vpop.f32.mrb[28].mxu0 }
 0x119   :  { %v2054_v29 = vpack.i.bf16 %v555_v26, %v563_v27  ;;  %v2737_v31 = vadd.f32 %v2600_v32, %v376_v28  ;;  %v1774_v35 = vpop.f32.mrb[29].mxu0 }
 0x11b   :  { %v564_v38 = vmax.f32 %v2737_v31, 0.0  ;;  %2055 = vrot.lane.b32.xlu0 %v2054_v29, %s2191_s15 }
 0x11c   :  { %v381_v3 = vpop.f32.mrb[30].mxu0 }
 0x11d   :  { %v2059_v40 = vpack.i.bf16 %v552_v36, %v564_v38  ;;  %v382_v41 = vadd.f32 %v2600_v32, %v381_v3  ;;  %v1777_v42 = vpop.f32.mrb[31].mxu0 }
 0x11f   :  { %v565_v46 = vmax.f32 %v382_v41, 0.0  ;;  %2060 = vrot.lane.b32.xlu0 %v2059_v40, %s2192_s17 }
 0x120   :  { %v386_v33 = vpop.f32.mrb[32].mxu0 }
 0x121   :  { %v2064_v48 = vpack.i.bf16 %v557_v8, %v565_v46  ;;  %v387_v49 = vadd.f32 %v2600_v32, %v386_v33  ;;  %v1780_v52 = vpop.f32.mrb[33].mxu0 }
 0x123   :  { %v2756_v55 = vmax.f32 %v387_v49, 0.0  ;;  %2065 = vrot.lane.b32.xlu1 %v2064_v48, %s2193_s18 }
 0x124   :  { %v391_v56 = vpop.f32.mrb[34].mxu0 }
 0x125   :  { %v392_v12 = vadd.f32 %v2600_v32, %v391_v56  ;;  %v1783_v57 = vpop.f32.mrb[35].mxu0  ;;  %v2069_v59 = vpack.i.bf16 %v554_v53, %v2756_v55 }
 0x127   :  { %v567_v1 = vmax.f32 %v392_v12, 0.0  ;;  %2070 = vrot.lane.b32.xlu0 %v2069_v59, %s2192_s17 }
 0x128   :  { %v396_v62 = vpop.f32.mrb[36].mxu0 }
 0x129   :  { %v2074_v6 = vpack.i.bf16 %v559_v20, %v567_v1  ;;  %v397_v11 = vadd.f32 %v2600_v32, %v396_v62  ;;  %v1786_v14 = vpop.f32.mrb[37].mxu0 }
 0x12b   :  { %v2769_v18 = vmax.f32 %v397_v11, 0.0  ;;  %2075 = vrot.lane.b32.xlu1 %v2074_v6, %s2193_s18 }
 0x12c   :  { %v401_v16 = vpop.f32.mrb[38].mxu0 }
 0x12d   :  { %v402_v5 = vadd.f32 %v2600_v32, %v401_v16  ;;  %v1789_v19 = vpop.f32.mrb[39].mxu0  ;;  %v2079_v23 = vpack.i.bf16 %v556_v15, %v2769_v18 }
 0x12f   :  { %v569_v21 = vmax.f32 %v402_v5, 0.0  ;;  %2080 = vrot.lane.b32.xlu1 %v2079_v23, %s2192_s17 }
 0x130   :  { %v406_v26 = vpop.f32.mrb[40].mxu0 }
 0x131   :  { %v2084_v2 = vpack.i.bf16 %v561_v51, %v569_v21  ;;  %v1792_v20 = vpop.f32.mrb[41].mxu0 }
 0x133   :  { %2085 = vrot.lane.b32.xlu0 %v2084_v2, %s2193_s18 }
 0x134   :  { %v411_v27 = vpop.f32.mrb[42].mxu0 }
 0x135   :  { %v1795_v28 = vpop.f32.mrb[43].mxu0  ;;  %v412_v14 = vadd.f32 %v2600_v32, %v411_v27 }
 0x137   :  { %v571_v19 = vmax.f32 %v412_v14, 0.0 }
 0x138   :  { %v2778_v29 = vpop.f32.mrb[44].mxu0 }
 0x139   :  { %v1798_v35 = vpop.f32.mrb[45].mxu0 }
 0x13c   :  { %v421_v37 = vpop.f32.mrb[46].mxu0 }
 0x13d   :  { %v422_v3 = vadd.f32 %v2600_v32, %v421_v37  ;;  %v1801_v40 = vpop.f32.mrb[47].mxu0 }
 0x13f   :  { %v573_v41 = vmax.f32 %v422_v3, 0.0  ;;  %v517_v3 = vadd.f32 %v2600_v32, %v2573_v17 }
 0x140   :  { %v2781_v42 = vpop.f32.mrb[48].mxu0 }
 0x141   :  { %v2089_v8 = vpack.i.bf16 %v565_v46, %v573_v41  ;;  %v1804_v33 = vpop.f32.mrb[49].mxu0  ;;  %v592_v17 = vmax.f32 %v517_v3, 0.0  ;;  %v2847_v3 = vadd.f32 %v2600_v32, %v2638_v60  ;;  %v427_v43 = vadd.f32 %v2600_v32, %v2781_v42 }
 0x143   :  { %2090 = vrot.lane.b32.xlu1 %v2089_v8, %s2191_s15  ;;  %v2808_v8 = vadd.f32 %v2600_v32, %v2604_v34 }
 0x144   :  { %v431_v45 = vpop.f32.mrb[50].mxu0 }
 0x145   :  { %v2785_v51 = vadd.f32 %v2600_v32, %v431_v45  ;;  %v1807_v48 = vpop.f32.mrb[51].mxu0  ;;  %v2815_v45 = vadd.f32 %v2600_v32, %v406_v26  ;;  %v594_v34 = vmax.f32 %v2808_v8, 0.0  ;;  %v512_v26 = vadd.f32 %v2600_v32, %v2569_v13 }
 0x147   :  { %v575_v49 = vmax.f32 %v2785_v51, 0.0  ;;  %v2119_v7 = vpack.i.bf16 %v594_v34, %v592_v17  ;;  %v591_v14 = vmax.f32 %v512_v26, 0.0  ;;  %v307_v17 = vadd.f32 %v2600_v32, %v2555_v58  ;;  %v876_v58 = vld [vmem:[%s3202_s2 + $0x100] sm:$0xff] }
 0x148   :  { %v2788_v52 = vpop.f32.mrb[52].mxu0 }
 0x149   :  { %v2094_v56 = vpack.i.bf16 %v567_v1, %v575_v49  ;;  %v1810_v12 = vpop.f32.mrb[53].mxu0 }
 0x14b   :  { %2095 = vrot.lane.b32.xlu0 %v2094_v56, %s2191_s15 }
 0x14c   :  { %v441_v57 = vpop.f32.mrb[54].mxu0 }
 0x14d   :  { %v442_v59 = vadd.f32 %v2600_v32, %v441_v57  ;;  %v1813_v46 = vpop.f32.mrb[55].mxu0 }
 0x14e   :  { %v570_v46 = vmax.f32 %v2815_v45, 0.0  ;;  %v1179_v45 = vld [vmem:[%s3204_s3 + $0x80] sm:$0xff] }
 0x14f   :  { %v577_v61 = vmax.f32 %v442_v59, 0.0 }
 0x150   :  { %v446_v62 = vpop.f32.mrb[56].mxu0 }
 0x151   :  { %v2109_v6 = vpack.i.bf16 %v569_v21, %v577_v61  ;;  %v1816_v11 = vpop.f32.mrb[57].mxu0  ;;  %v2795_v1 = vadd.f32 %v2600_v32, %v446_v62 }
 0x153   :  { %v578_v37 = vmax.f32 %v2795_v1, 0.0 }
 0x154   :  { %v451_v15 = vpop.f32.mrb[58].mxu0 }
 0x155   :  { %v452_v16 = vadd.f32 %v2600_v32, %v451_v15  ;;  %v1819_v5 = vpop.f32.mrb[59].mxu0 }
 0x157   :  { %v579_v23 = vmax.f32 %v452_v16, 0.0 }
 0x158   :  { %v456_v2 = vpop.f32.mrb[60].mxu0 }
 0x159   :  { %v2114_v20 = vpack.i.bf16 %v579_v23, %v587_v50  ;;  %v2099_v28 = vpack.i.bf16 %v571_v19, %v579_v23  ;;  %v457_v35 = vadd.f32 %v2600_v32, %v456_v2  ;;  %v1822_v21 = vpop.f32.mrb[61].mxu0  ;;  %v522_v19 = vadd.f32 %v2600_v32, %v2586_v24 }
 0x15b   :  { %v2801_v27 = vmax.f32 %v457_v35, 0.0  ;;  %2100 = vrot.lane.b32.xlu1 %v2099_v28, %s2193_s18  ;;  %v593_v28 = vmax.f32 %v522_v19, 0.0  ;;  %v357_v19 = vadd.f32 %v2600_v32, %v2670_v25 }
 0x15c   :  { %v461_v40 = vpop.f32.mrb[62].mxu0 }
 0x15d   :  { %v462_v39 = vadd.f32 %v2600_v32, %v461_v40  ;;  %v1825_v50 = vpop.f32.mrb[63].mxu0  ;;  %v2104_v33 = vpack.i.bf16 %v2801_v27, %v578_v37 }
 0x15f   :  { %v581_v51 = vmax.f32 %v462_v39, 0.0  ;;  %2115 = vrot.lane.b32.xlu1 %v2114_v20, %s2191_s15  ;;  %2105 = vrot.lane.b32.xlu0 %v2104_v33, %s2192_s17  ;;  %v596_v39 = vmax.f32 %v2847_v3, 0.0  ;;  %v1164_v3 = vld [vmem:[%s3204_s3 + $0x8] sm:$0xff] }
 0x160   :  { %v466_v48 = vpop.f32.mrb[64].mxu0 }
 0x161   :  { %v2139_v56 = vpack.i.bf16 %v581_v51, %v589_v30  ;;  %v2124_v12 = vpack.i.bf16 %v573_v41, %v581_v51  ;;  %v467_v57 = vadd.f32 %v2600_v32, %v466_v48  ;;  %v1828_v59 = vpop.f32.mrb[65].mxu0  ;;  %v347_v48 = vadd.f32 %v2600_v32, %v2621_v44  ;;  %v877_v44 = vld [vmem:[%s3202_s2 + $0x108] sm:$0xff] }
 0x163   :  { %v2826_v61 = vmax.f32 %v467_v57, 0.0  ;;  %2110 = vrot.lane.b32.xlu0 %v2109_v6, %s2191_s15  ;;  %2125 = vrot.lane.b32.xlu1 %v2124_v12, %s2193_s18  ;;  %v2871_v57 = vpop.f32.mrb[22].mxu1 }
 0x164   :  { %v471_v62 = vpop.f32.mrb[66].mxu0 }
 0x165   :  { %v472_v30 = vadd.f32 %v2600_v32, %v471_v62  ;;  %v1831_v41 = vpop.f32.mrb[67].mxu0  ;;  %v2129_v11 = vpack.i.bf16 %v570_v46, %v2826_v61  ;;  %v1876_v62 = vpop.f32.mrb[23].mxu1 }
 0x166   :  { %v367_v62 = vadd.f32 %v2600_v32, %v2705_v54 }
 0x167   :  { %v583_v15 = vmax.f32 %v472_v30, 0.0  ;;  %2120 = vrot.lane.b32.xlu0 %v2119_v7, %s2192_s17  ;;  %2130 = vrot.lane.b32.xlu1 %v2129_v11, %s2192_s17  ;;  %v550_v7 = vmax.f32 %v307_v17, 0.0  ;;  %v558_v30 = vmax.f32 %v347_v48, 0.0  ;;  %v560_v17 = vmax.f32 %v357_v19, 0.0 }
 0x168   :  { %v476_v13 = vpop.f32.mrb[68].mxu0 }
 0x169   :  { %v2154_v6 = vpack.i.bf16 %v583_v15, %v591_v14  ;;  %v2134_v16 = vpack.i.bf16 %v575_v49, %v583_v15  ;;  %v1834_v5 = vpop.f32.mrb[69].mxu0  ;;  %v2850_v49 = vadd.f32 %v2600_v32, %v476_v13 }
 0x16a   :  { %v1979_v5 = vpack.c.bf16 %v877_v44, %v876_v58 }
 0x16b   :  { %2135 = vrot.lane.b32.xlu0 %v2134_v16, %s2193_s18  ;;  %v584_v50 = vmax.f32 %v2850_v49, 0.0  ;;  %v1181_v49 = vld [vmem:[%s3204_s3 + $0x90] sm:$0xff] }
 0x16c   :  { %v481_v23 = vpop.f32.mrb[70].mxu0 }
 0x16d   :  { %v482_v2 = vadd.f32 %v2600_v32, %v481_v23  ;;  %v1837_v20 = vpop.f32.mrb[71].mxu0  ;;  %v2159_v60 = vpack.i.bf16 %v584_v50, %v596_v39 }
 0x16e   :  { %v878_v20 = vld [vmem:[%s3202_s2 + $0x110] sm:$0xff] }
 0x16f   :  { %v585_v35 = vmax.f32 %v482_v2, 0.0  ;;  %2140 = vrot.lane.b32.xlu0 %v2139_v56, %s2191_s15 }
 0x170   :  { %v2843_v21 = vpop.f32.mrb[72].mxu0 }
 0x171   :  { %v2144_v24 = vpack.i.bf16 %v585_v35, %v593_v28  ;;  %v1840_v40 = vpop.f32.mrb[73].mxu0  ;;  %v879_v28 = vld [vmem:[%s3202_s2 + $0x118] sm:$0xff] }
 0x173   :  { %2155 = vrot.lane.b32.xlu0 %v2154_v6, %s2191_s15  ;;  %2145 = vrot.lane.b32.xlu1 %v2144_v24, %s2193_s18 }
 0x177   :  { %2165 = vrot.lane.b32.xlu0 %v2696_v47, %s2193_s18  ;;  %2150 = vrot.lane.b32.xlu1 %v2655_v10, %s2193_s18 }
 0x17b   :  { %2160 = vrot.lane.b32.xlu1 %v2159_v60, %s2192_s17 }
 0x17d   :  { %v2046_v33 = vpop.permute.xlu0 %2045 }
 0x17e   :  { %v2048_v12 = vunpack.i.h.bf16 %v2046_v33  ;;  %v2047_v10 = vunpack.i.l.bf16 %v2046_v33  ;;  %v1982_v33 = vpack.c.bf16 %v879_v28, %v878_v20 }
 0x180   :  { %v788_v11 = vsel %vm787_vm3, %v550_v7, %v2048_v12  ;;  %v817_v13 = vsel %vm787_vm3, %v558_v30, %v2047_v10 }
 0x185   :  { %v2051_v47 = vpop.permute.xlu1 %2050 }
 0x186   :  { %v2053_v24 = vunpack.i.h.bf16 %v2051_v47  ;;  %v2052_v40 = vunpack.i.l.bf16 %v2051_v47 }
 0x188   :  { %v818_v10 = vsel %vm787_vm3, %v560_v17, %v2052_v40 }
 0x18d   :  { %v2865_v51 = vpop.permute.xlu0 %2055 }
 0x18e   :  { %v2058_v44 = vunpack.i.h.bf16 %v2865_v51  ;;  %v2057_v22 = vunpack.i.l.bf16 %v2865_v51 }
 0x190   :  { %v790_v54 = vsel %vm787_vm3, %v554_v53, %v2058_v44 }
 0x191   :  { %v2061_v56 = vpop.permute.xlu0 %2060 }
 0x192   :  { %v2063_v59 = vunpack.i.h.bf16 %v2061_v56  ;;  %v2062_v26 = vunpack.i.l.bf16 %v2061_v56 }
 0x194   :  { %v798_v6 = vsel %vm797_vm4, %v788_v11, %v2063_v59  ;;  %v826_v16 = vsel %vm797_vm4, %v817_v13, %v2062_v26  ;;  %v789_v59 = vsel %vm787_vm3, %v552_v36, %v2053_v24  ;;  %v562_v11 = vmax.f32 %v367_v62, 0.0 }
 0x195   :  { %v2066_v41 = vpop.permute.xlu1 %2065 }
 0x196   :  { %v2068_v14 = vunpack.i.h.bf16 %v2066_v41  ;;  %v2067_v15 = vunpack.i.l.bf16 %v2066_v41 }
 0x198   :  { %v835_v23 = vsel %vm807_vm5, %v826_v16, %v2067_v15  ;;  %v808_v2 = vsel %vm807_vm5, %v798_v6, %v2068_v14  ;;  %v819_v6 = vsel %vm787_vm3, %v562_v11, %v2057_v22  ;;  %v437_v11 = vadd.f32 %v2600_v32, %v2788_v52 }
 0x199   :  { %968 = vmatprep.mubr.f32.mxu1 %v835_v23  ;;  %v2893_v35 = vpop.permute.xlu0 %2070 }
 0x19a   :  { %969 = vmatmul.mubr.f32.vlgmr.msra.gmra.mrb[24].mxu1 %v808_v2  ;;  %v2073_v25 = vunpack.i.h.bf16 %v2893_v35  ;;  %v2072_v60 = vunpack.i.l.bf16 %v2893_v35  ;;  %v417_v2 = vadd.f32 %v2600_v32, %v2778_v29 }
 0x19b   :  { %1980 = vmatpush3.bf16.msra.mxu1 %v1979_v5 }
 0x19c   :  { %1981 = vmatprep.subr.bf16.mxu1 %v2188_v0  ;;  %v827_v47 = vsel %vm797_vm4, %v818_v10, %v2072_v60  ;;  %v799_v26 = vsel %vm797_vm4, %v789_v59, %v2073_v25  ;;  %v572_v24 = vmax.f32 %v417_v2, 0.0 }
 0x19d   :  { %v2076_v48 = vpop.permute.xlu1 %2075 }
 0x19e   :  { %v2078_v56 = vunpack.i.h.bf16 %v2076_v48  ;;  %v2077_v12 = vunpack.i.l.bf16 %v2076_v48 }
 0x19f   :  { %1983 = vmatpush3.bf16.msra.mxu1 %v1982_v33 }
 0x1a0   :  { %v836_v7 = vsel %vm807_vm5, %v827_v47, %v2077_v12  ;;  %v809_v30 = vsel %vm807_vm5, %v799_v26, %v2078_v56  ;;  %v574_v12 = vmax.f32 %v427_v43, 0.0 }
 0x1a1   :  { %973 = vmatprep.mubr.f32.mxu1 %v836_v7  ;;  %v2081_v58 = vpop.permute.xlu1 %2080 }
 0x1a2   :  { %974 = vmatmul.mubr.f32.gmra.mrb[26].mxu1 %v809_v30  ;;  %v2083_v36 = vunpack.i.h.bf16 %v2081_v58  ;;  %v2082_v41 = vunpack.i.l.bf16 %v2081_v58 }
 0x1a4   :  { %v828_v16 = vsel %vm797_vm4, %v819_v6, %v2082_v41  ;;  %v800_v5 = vsel %vm797_vm4, %v790_v54, %v2083_v36 }
 0x1a5   :  { %v2086_v14 = vpop.permute.xlu0 %2085 }
 0x1a6   :  { %v2088_v15 = vunpack.i.h.bf16 %v2086_v14  ;;  %v2087_v13 = vunpack.i.l.bf16 %v2086_v14 }
 0x1a8   :  { %v837_v19 = vsel %vm807_vm5, %v828_v16, %v2087_v13  ;;  %v810_v51 = vsel %vm807_vm5, %v800_v5, %v2088_v15 }
 0x1a9   :  { %978 = vmatprep.mubr.f32.mxu1 %v837_v19 }
 0x1aa   :  { %979 = vmatmul.mubr.f32.gmra.mrb[28].mxu1 %v810_v51  ;;  %v576_v51 = vmax.f32 %v437_v11, 0.0 }
 0x1b5   :  { %v2091_v23 = vpop.permute.xlu1 %2090 }
 0x1b6   :  { %v2093_v35 = vunpack.i.h.bf16 %v2091_v23  ;;  %v2092_v53 = vunpack.i.l.bf16 %v2091_v23  ;;  %v487_v23 = vadd.f32 %v2600_v32, %v2843_v21  ;;  %v497_v21 = vadd.f32 %v2600_v32, %v2557_v63 }
 0x1b8   :  { %v791_v29 = vsel %vm787_vm3, %v564_v38, %v2093_v35  ;;  %v820_v42 = vsel %vm787_vm3, %v572_v24, %v2092_v53 }
 0x1b9   :  { %v801_v30 = vsel %vm797_vm4, %v791_v29, %v2072_v60 }
 0x1bd   :  { %v2096_v20 = vpop.permute.xlu0 %2095 }
 0x1be   :  { %v2097_v40 = vunpack.i.l.bf16 %v2096_v20  ;;  %v2098_v17 = vunpack.i.h.bf16 %v2096_v20 }
 0x1c0   :  { %v821_v58 = vsel %vm787_vm3, %v574_v12, %v2097_v40  ;;  %v792_v22 = vsel %vm787_vm3, %v2756_v55, %v2098_v17  ;;  %v586_v17 = vmax.f32 %v487_v23, 0.0 }
 0x1c1   :  { %v802_v13 = vsel %vm797_vm4, %v792_v22, %v2082_v41 }
 0x1cd   :  { %v2101_v28 = vpop.permute.xlu1 %2100 }
 0x1ce   :  { %v2103_v48 = vunpack.i.h.bf16 %v2101_v28  ;;  %v2102_v10 = vunpack.i.l.bf16 %v2101_v28 }
 0x1d0   :  { %v811_v38 = vsel %vm807_vm5, %v801_v30, %v2103_v48 }
 0x1d1   :  { %v2922_v25 = vpop.permute.xlu1 %2115  ;;  %v2924_v33 = vpop.permute.xlu0 %2105 }
 0x1d2   :  { %v2107_v56 = vunpack.i.l.bf16 %v2924_v33  ;;  %v2108_v59 = vunpack.i.h.bf16 %v2924_v33  ;;  %v2118_v53 = vunpack.i.h.bf16 %v2922_v25  ;;  %v2117_v48 = vunpack.i.l.bf16 %v2922_v25 }
 0x1d4   :  { %v829_v47 = vsel %vm797_vm4, %v820_v42, %v2107_v56  ;;  %v830_v36 = vsel %vm797_vm4, %v821_v58, %v2108_v59  ;;  %v823_v30 = vsel %vm787_vm3, %v586_v17, %v2117_v48  ;;  %v1167_v17 = vld [vmem:[%s3204_s3 + $0x20] sm:$0xff]  ;;  %v1168_v48 = vld [vmem:[%s3204_s3 + $0x28] sm:$0xff] }
 0x1d5   :  { %v2111_v26 = vpop.permute.xlu0 %2110  ;;  %v2126_v62 = vpop.permute.xlu1 %2125  ;;  %v838_v7 = vsel %vm807_vm5, %v829_v47, %v2102_v10  ;;  %v794_v10 = vsel %vm787_vm3, %v578_v37, %v2118_v53  ;;  %v588_v47 = vmax.f32 %v497_v21, 0.0  ;;  %v507_v37 = vadd.f32 %v2600_v32, %v2565_v9  ;;  %v1166_v53 = vld [vmem:[%s3204_s3 + $0x18] sm:$0xff] }
 0x1d6   :  { %v2128_v44 = vunpack.i.h.bf16 %v2126_v62  ;;  %v2127_v31 = vunpack.i.l.bf16 %v2126_v62  ;;  %983 = vmatprep.mubr.f32.mxu1 %v838_v7  ;;  %v2113_v6 = vunpack.i.h.bf16 %v2111_v26  ;;  %v2112_v54 = vunpack.i.l.bf16 %v2111_v26 }
 0x1d7   :  { %984 = vmatmul.mubr.f32.gmra.mrb[30].mxu1 %v811_v38  ;;  %v804_v58 = vsel %vm797_vm4, %v794_v10, %v2108_v59 }
 0x1d8   :  { %v839_v14 = vsel %vm807_vm5, %v830_v36, %v2127_v31  ;;  %v812_v16 = vsel %vm807_vm5, %v802_v13, %v2128_v44  ;;  %v822_v28 = vsel %vm787_vm3, %v576_v51, %v2112_v54  ;;  %v793_v35 = vsel %vm787_vm3, %v2769_v18, %v2113_v6 }
 0x1d9   :  { %v2121_v15 = vpop.permute.xlu0 %2120  ;;  %988 = vmatprep.mubr.f32.mxu1 %v839_v14  ;;  %v2131_v60 = vpop.permute.xlu1 %2130 }
 0x1da   :  { %v2133_v5 = vunpack.i.h.bf16 %v2131_v60  ;;  %v2132_v19 = vunpack.i.l.bf16 %v2131_v60  ;;  %v2122_v56 = vunpack.i.l.bf16 %v2121_v15  ;;  %v2123_v38 = vunpack.i.h.bf16 %v2121_v15 }
 0x1db   :  { %989 = vmatmul.mubr.f32.gmra.mrb[32].mxu1 %v812_v16 }
 0x1dc   :  { %v831_v41 = vsel %vm797_vm4, %v822_v28, %v2132_v19  ;;  %v803_v43 = vsel %vm797_vm4, %v793_v35, %v2133_v5  ;;  %v832_v63 = vsel %vm797_vm4, %v823_v30, %v2122_v56  ;;  %v590_v5 = vmax.f32 %v507_v37, 0.0  ;;  %v1185_v56 = vld [vmem:[%s3204_s3 + $0xb0] sm:$0xff]  ;;  %v1187_v30 = vld [vmem:[%s3204_s3 + $0xc0] sm:$0xff]  ;;  %v1190_v37 = vld [vmem:[%s3204_s3 + $0xd8] sm:$0xff] }
 0x1dd   :  { %v2136_v2 = vpop.permute.xlu0 %2135 }
 0x1de   :  { %v2138_v52 = vunpack.i.h.bf16 %v2136_v2  ;;  %v2137_v20 = vunpack.i.l.bf16 %v2136_v2 }
 0x1e0   :  { %v840_v24 = vsel %vm807_vm5, %v831_v41, %v2137_v20  ;;  %v813_v40 = vsel %vm807_vm5, %v803_v43, %v2138_v52  ;;  %v1165_v43 = vld [vmem:[%s3204_s3 + $0x10] sm:$0xff] }
 0x1e1   :  { %v2141_v33 = vpop.permute.xlu0 %2140  ;;  %993 = vmatprep.mubr.f32.mxu1 %v840_v24  ;;  %v1183_v24 = vld [vmem:[%s3204_s3 + $0xa0] sm:$0xff] }
 0x1e2   :  { %994 = vmatmul.mubr.f32.gmra.mrb[34].mxu1 %v813_v40  ;;  %v2143_v29 = vunpack.i.h.bf16 %v2141_v33  ;;  %v2142_v12 = vunpack.i.l.bf16 %v2141_v33  ;;  %v1184_v40 = vld [vmem:[%s3204_s3 + $0xa8] sm:$0xff]  ;;  %v1990_v33 = vpack.c.bf16 %v1166_v53, %v1165_v43 }
 0x1e3   :  { %v1992_v21 = vpack.c.bf16 %v1184_v40, %v1183_v24 }
 0x1e4   :  { %v824_v31 = vsel %vm787_vm3, %v588_v47, %v2142_v12  ;;  %v795_v1 = vsel %vm787_vm3, %v2801_v27, %v2143_v29  ;;  %v1186_v29 = vld [vmem:[%s3204_s3 + $0xb8] sm:$0xff] }
 0x1e5   :  { %v2146_v42 = vpop.permute.xlu1 %2145  ;;  %v2156_v26 = vpop.permute.xlu0 %2155  ;;  %v833_v60 = vsel %vm797_vm4, %v824_v31, %v2123_v38  ;;  %v805_v13 = vsel %vm797_vm4, %v795_v1, %v2132_v19  ;;  %v1172_v31 = vld [vmem:[%s3204_s3 + $0x48] sm:$0xff]  ;;  %v1189_v1 = vld [vmem:[%s3204_s3 + $0xd0] sm:$0xff] }
 0x1e6   :  { %v2148_v62 = vunpack.i.h.bf16 %v2146_v42  ;;  %v2147_v7 = vunpack.i.l.bf16 %v2146_v42  ;;  %v2158_v14 = vunpack.i.h.bf16 %v2156_v26  ;;  %v2157_v59 = vunpack.i.l.bf16 %v2156_v26 }
 0x1e7   :  { %v1994_v42 = vpack.c.bf16 %v1168_v48, %v1167_v17  ;;  %v1996_v26 = vpack.c.bf16 %v1186_v29, %v1185_v56  ;;  %v1192_v48 = vld [vmem:[%s3204_s3 + $0xe8] sm:$0xff] }
 0x1e8   :  { %v841_v25 = vsel %vm807_vm5, %v832_v63, %v2147_v7  ;;  %v814_v44 = vsel %vm807_vm5, %v804_v58, %v2148_v62  ;;  %v825_v52 = vsel %vm787_vm3, %v590_v5, %v2157_v59  ;;  %v796_v20 = vsel %vm787_vm3, %v2826_v61, %v2158_v14  ;;  %v1169_v62 = vld [vmem:[%s3204_s3 + $0x30] sm:$0xff]  ;;  %v1170_v7 = vld [vmem:[%s3204_s3 + $0x38] sm:$0xff]  ;;  %v1188_v63 = vld [vmem:[%s3204_s3 + $0xc8] sm:$0xff] }
 0x1e9   :  { %v2151_v22 = vpop.permute.xlu1 %2150  ;;  %998 = vmatprep.mubr.f32.mxu1 %v841_v25  ;;  %v2166_v6 = vpop.permute.xlu0 %2165  ;;  %v1998_v58 = vpack.c.bf16 %v1170_v7, %v1169_v62  ;;  %v2000_v25 = vpack.c.bf16 %v1188_v63, %v1187_v30  ;;  %v2004_v14 = vpack.c.bf16 %v1190_v37, %v1189_v1  ;;  %v1173_v59 = vld [vmem:[%s3204_s3 + $0x50] sm:$0xff]  ;;  %v1194_v30 = vld [vmem:[%s3204_s3 + $0xf8] sm:$0xff] }
 0x1ea   :  { %v2153_v36 = vunpack.i.h.bf16 %v2151_v22  ;;  %v2152_v11 = vunpack.i.l.bf16 %v2151_v22  ;;  %999 = vmatmul.mubr.f32.gmra.mrb[36].mxu1 %v814_v44  ;;  %v2168_v23 = vunpack.i.h.bf16 %v2166_v6  ;;  %v2167_v2 = vunpack.i.l.bf16 %v2166_v6  ;;  %v1171_v44 = vld [vmem:[%s3204_s3 + $0x40] sm:$0xff]  ;;  %v1193_v7 = vld [vmem:[%s3204_s3 + $0xf0] sm:$0xff] }
 0x1ec   :  { %v842_v54 = vsel %vm807_vm5, %v833_v60, %v2152_v11  ;;  %v815_v16 = vsel %vm807_vm5, %v805_v13, %v2153_v36  ;;  %v2002_v36 = vpack.c.bf16 %v1172_v31, %v1171_v44  ;;  %v1174_v60 = vld [vmem:[%s3204_s3 + $0x58] sm:$0xff] }
 0x1ed   :  { %v2161_v51 = vpop.permute.xlu1 %2160  ;;  %1003 = vmatprep.mubr.f32.mxu1 %v842_v54  ;;  %v2006_v13 = vpack.c.bf16 %v1174_v60, %v1173_v59  ;;  %v1178_v44 = vld [vmem:[%s3204_s3 + $0x78] sm:$0xff] }
 0x1ee   :  { %v2163_v9 = vunpack.i.h.bf16 %v2161_v51  ;;  %v2162_v15 = vunpack.i.l.bf16 %v2161_v51  ;;  %1004 = vmatmul.mubr.f32.gmra.mrb[38].mxu1 %v815_v16 }
 0x1f0   :  { %v834_v19 = vsel %vm797_vm4, %v825_v52, %v2162_v15  ;;  %v806_v28 = vsel %vm797_vm4, %v796_v20, %v2163_v9 }
 0x1f1   :  { %v843_v35 = vsel %vm807_vm5, %v834_v19, %v2167_v2  ;;  %v816_v41 = vsel %vm807_vm5, %v806_v28, %v2168_v23 }
 0x1f2   :  { %1008 = vmatprep.mubr.f32.mxu1 %v843_v35 }
 0x1f3   :  { %1009 = vmatmul.mubr.f32.gmra.mrb[40].mxu1 %v816_v41 }
 0x1f4   :  { %1885 = vmatprep.mubr.msk.f32.mxu1 %vm2189_vm0, %v2190_v4 }
 0x1f7   :  { %1886 = vmatmul.mubr.msk.f32.vlgmr.msra.gmra.mrb[42].mxu1 %vm787_vm3, %v2756_v55  ;;  %v547_v55 = vadd.f32 %v2600_v32, %v2871_v57  ;;  %v1180_v32 = vld [vmem:[%s3204_s3 + $0x88] sm:$0xff] }
 0x1f8   :  { %1888 = vmatprep.mubr.msk.f32.mxu1 %vm2189_vm0, %v2190_v4 }
 0x1fb   :  { %1889 = vmatmul.mubr.msk.f32.gmra.mrb[44].mxu1 %vm787_vm3, %v2769_v18  ;;  %v598_v18 = vmax.f32 %v547_v55, 0.0 }
 0x1fc   :  { %1891 = vmatprep.mubr.msk.f32.mxu1 %vm2189_vm0, %v2190_v4 }
 0x1ff   :  { %1892 = vmatmul.mubr.msk.f32.gmra.mrb[46].mxu1 %vm787_vm3, %v570_v46 }
 0x200   :  { %1894 = vmatprep.mubr.msk.f32.mxu1 %vm2189_vm0, %v2190_v4 }
 0x203   :  { %1895 = vmatmul.mubr.msk.f32.gmra.mrb[48].mxu1 %vm787_vm3, %v2801_v27 }
 0x204   :  { %1897 = vmatprep.mubr.msk.f32.mxu1 %vm2189_vm0, %v2190_v4 }
 0x207   :  { %1898 = vmatmul.mubr.msk.f32.gmra.mrb[50].mxu1 %vm787_vm3, %v2826_v61  ;;  %v1984_v61 = vpack.c.bf16 %v1180_v32, %v1179_v45 }
 0x208   :  { %1900 = vmatprep.mubr.msk.f32.mxu1 %vm2189_vm0, %v2190_v4 }
 0x209   :  { %1985 = vmatprep.subr.bf16.mxu1 %v1984_v61 }
 0x20b   :  { %1901 = vmatmul.mubr.msk.f32.gmra.mrb[52].mxu1 %vm787_vm3, %v584_v50 }
 0x20c   :  { %1903 = vmatprep.mubr.msk.f32.mxu1 %vm2189_vm0, %v2190_v4 }
 0x20f   :  { %1904 = vmatmul.mubr.msk.f32.gmra.mrb[54].mxu1 %vm787_vm3, %v594_v34  ;;  %v1163_v34 = vld [vmem:[%s3204_s3] sm:$0xff] }
 0x210   :  { %1906 = vmatprep.mubr.msk.f32.mxu1 %vm2189_vm0, %v2190_v4  ;;  %v1986_v50 = vpack.c.bf16 %v1164_v3, %v1163_v34 }
 0x212   :  { %1987 = vmatpush3.bf16.msra.mxu1 %v1986_v50 }
 0x213   :  { %1907 = vmatmul.mubr.msk.f32.gmra.mrb[56].mxu1 %vm787_vm3, %v596_v39  ;;  %v1182_v39 = vld [vmem:[%s3204_s3 + $0x98] sm:$0xff] }
 0x214   :  { %1909 = vmatprep.mubr.msk.f32.mxu1 %vm2189_vm0, %v2190_v4  ;;  %v1988_v57 = vpack.c.bf16 %v1182_v39, %v1181_v49 }
 0x216   :  { %1989 = vmatprep.subr.bf16.mxu1 %v1988_v57 }
 0x217   :  { %1910 = vmatmul.mubr.msk.f32.gmra.mrb[58].mxu1 %vm787_vm3, %v598_v18  ;;  %v1529_v18 = vld [vmem:[%s3203_s5 + $0x1] ss:$0 sm:$0xff] }
 0x218   :  { %1991 = vmatpush3.bf16.msra.mxu1 %v1990_v33 }
 0x219   :  { %1993 = vmatprep.subr.bf16.mxu1 %v1992_v21 }
 0x21c   :  { %1995 = vmatpush3.bf16.msra.mxu1 %v1994_v42 }
 0x21d   :  { %1997 = vmatprep.subr.bf16.mxu1 %v1996_v26 }
 0x220   :  { %1999 = vmatpush3.bf16.msra.mxu1 %v1998_v58  ;;  %v2012_v58 = vpack.c.bf16 %v1194_v30, %v1193_v7 }
 0x221   :  { %2001 = vmatprep.subr.bf16.mxu1 %v2000_v25  ;;  %v1177_v25 = vld [vmem:[%s3204_s3 + $0x70] sm:$0xff] }
 0x222   :  { %v2014_v1 = vpack.c.bf16 %v1178_v44, %v1177_v25 }
 0x224   :  { %2003 = vmatpush3.bf16.msra.mxu1 %v2002_v36 }
 0x225   :  { %2005 = vmatprep.subr.bf16.mxu1 %v2004_v14 }
 0x228   :  { %2007 = vmatpush3.bf16.msra.mxu1 %v2006_v13 }
 0x26d   :  { %v1632_v27 = vpop.f32.mrb[24].mxu1 }
 0x26e   :  { %v1633_v8 = vpop.f32.mrb[25].mxu1 }
 0x26f   :  { %v3032_v46 = vadd.f32 %v1633_v8, %v1632_v27 }
 0x271   :  { %v971_v45 = vadd.f32 %v3032_v46, %v1529_v18  ;;  %v1191_v46 = vld [vmem:[%s3204_s3 + $0xe0] sm:$0xff] }
 0x272   :  { %v2008_v29 = vpack.c.bf16 %v1192_v48, %v1191_v46  ;;  %v1198_v46 = vld [vmem:[%s3204_s3 + $0x118] sm:$0xff] }
 0x274   :  { %2009 = vmatprep.subr.bf16.mxu1 %v2008_v29 }
 0x275   :  { %v1635_v12 = vpop.f32.mrb[26].mxu1 }
 0x276   :  { %v1636_v10 = vpop.f32.mrb[27].mxu1 }
 0x277   :  { %v1637_v47 = vadd.f32 %v1636_v10, %v1635_v12  ;;  %v1175_v12 = vld [vmem:[%s3204_s3 + $0x60] sm:$0xff]  ;;  %v1176_v10 = vld [vmem:[%s3204_s3 + $0x68] sm:$0xff] }
 0x279   :  { %v976_v3 = vadd.f32 %v1637_v47, %v1529_v18  ;;  %v2010_v47 = vpack.c.bf16 %v1176_v10, %v1175_v12 }
 0x27b   :  { %2011 = vmatpush3.bf16.msra.mxu1 %v2010_v47 }
 0x27c   :  { %2013 = vmatprep.subr.bf16.mxu1 %v2012_v58 }
 0x27d   :  { %v1638_v38 = vpop.f32.mrb[28].mxu1 }
 0x27e   :  { %v1639_v22 = vpop.f32.mrb[29].mxu1 }
 0x27f   :  { %v1640_v11 = vadd.f32 %v1639_v22, %v1638_v38  ;;  %2015 = vmatpush3.bf16.msra.mxu1 %v2014_v1  ;;  %v1375_v1 = vld [vmem:[%s3206_s4] sm:$0xff] }
 0x280   :  { %2016 = vmatprep.subr.bf16.mxu1 %v2188_v0 }
 0x281   :  { %v981_v57 = vadd.f32 %v1640_v11, %v1529_v18 }
 0x2aa   :  { %v1641_v6 = vpop.f32.mrb[30].mxu1 }
 0x2ab   :  { %v1642_v54 = vpop.f32.mrb[31].mxu1 }
 0x2ac   :  { %v1643_v16 = vadd.f32 %v1642_v54, %v1641_v6 }
 0x2ae   :  { %v1644_v5 = vpop.f32.mrb[32].mxu1  ;;  %v986_v40 = vadd.f32 %v1643_v16, %v1529_v18 }
 0x2af   :  { %v1645_v51 = vpop.f32.mrb[33].mxu1 }
 0x2b0   :  { %v1646_v9 = vadd.f32 %v1645_v51, %v1644_v5 }
 0x2b2   :  { %v991_v56 = vadd.f32 %v1646_v9, %v1529_v18 }
 0x2b5   :  { %v1647_v15 = vpop.f32.mrb[34].mxu1 }
 0x2b6   :  { %v1648_v23 = vpop.f32.mrb[35].mxu1 }
 0x2b7   :  { %v1649_v2 = vadd.f32 %v1648_v23, %v1647_v15 }
 0x2b9   :  { %v996_v63 = vadd.f32 %v1649_v2, %v1529_v18 }
 0x2bd   :  { %v1650_v52 = vpop.f32.mrb[36].mxu1 }
 0x2be   :  { %v1651_v20 = vpop.f32.mrb[37].mxu1 }
 0x2bf   :  { %v1652_v19 = vadd.f32 %v1651_v20, %v1650_v52 }
 0x2c1   :  { %v1653_v28 = vpop.f32.mrb[38].mxu1  ;;  %v1001_v11 = vadd.f32 %v1652_v19, %v1529_v18 }
 0x2c2   :  { %v1654_v35 = vpop.f32.mrb[39].mxu1 }
 0x2c3   :  { %v1655_v41 = vadd.f32 %v1654_v35, %v1653_v28 }
 0x2c5   :  { %v1006_v16 = vadd.f32 %v1655_v41, %v1529_v18 }
 0x2c6   :  { %v1656_v55 = vpop.f32.mrb[40].mxu1 }
 0x2c7   :  { %v1657_v27 = vpop.f32.mrb[41].mxu1 }
 0x2c8   :  { %v1658_v8 = vadd.f32 %v1657_v27, %v1656_v55 }
 0x2ca   :  { %v1080_v32 = vpop.f32.mrb[42].mxu1  ;;  %v1011_v52 = vadd.f32 %v1658_v8, %v1529_v18  ;;  %v1196_v18 = vld [vmem:[%s3204_s3 + $0x108] sm:$0xff] }
 0x2cb   :  { %v3101_v34 = vadd.f32 %v1080_v32, %v971_v45  ;;  %v1887_v61 = vpop.f32.mrb[43].mxu1 }
 0x2ce   :  { %v1085_v49 = vpop.f32.mrb[44].mxu1 }
 0x2cf   :  { %v1086_v39 = vadd.f32 %v1085_v49, %v976_v3  ;;  %v1890_v50 = vpop.f32.mrb[45].mxu1  ;;  %v1124_v3 = vmax.f32 %v3101_v34, 0.0 }
 0x2d1   :  { %v1125_v22 = vmax.f32 %v1086_v39, 0.0  ;;  %v1195_v39 = vld [vmem:[%s3204_s3 + $0x100] sm:$0xff] }
 0x2d2   :  { %v1090_v43 = vpop.f32.mrb[46].mxu1 }
 0x2d3   :  { %v1091_v53 = vadd.f32 %v1090_v43, %v981_v57  ;;  %v1893_v24 = vpop.f32.mrb[47].mxu1 }
 0x2d5   :  { %v1126_v6 = vmax.f32 %v1091_v53, 0.0 }
 0x2d6   :  { %v1095_v33 = vpop.f32.mrb[48].mxu1 }
 0x2d7   :  { %v1096_v21 = vadd.f32 %v1095_v33, %v986_v40  ;;  %v1896_v17 = vpop.f32.mrb[49].mxu1  ;;  %v2017_v40 = vpack.c.bf16 %v1196_v18, %v1195_v39 }
 0x2d8   :  { %v1197_v17 = vld [vmem:[%s3204_s3 + $0x110] sm:$0xff] }
 0x2d9   :  { %v1127_v23 = vmax.f32 %v1096_v21, 0.0  ;;  %v2020_v48 = vpack.c.bf16 %v1198_v46, %v1197_v17 }
 0x2da   :  { %v1100_v42 = vpop.f32.mrb[50].mxu1 }
 0x2db   :  { %v1101_v26 = vadd.f32 %v1100_v42, %v991_v56  ;;  %v1899_v62 = vpop.f32.mrb[51].mxu1  ;;  %v1539_v42 = vld [vmem:[%s3205_s6] ss:$0 sm:$0xff] }
 0x2dd   :  { %v1128_v49 = vmax.f32 %v1101_v26, 0.0 }
 0x2de   :  { %v1105_v31 = vpop.f32.mrb[52].mxu1 }
 0x2df   :  { %v1106_v37 = vadd.f32 %v1105_v31, %v996_v63  ;;  %v1902_v38 = vpop.f32.mrb[53].mxu1 }
 0x2e1   :  { %v1129_v36 = vmax.f32 %v1106_v37, 0.0  ;;  %v1376_v37 = vld [vmem:[%s3206_s4 + $0x8] sm:$0xff] }
 0x2e2   :  { %v1110_v14 = vpop.f32.mrb[54].mxu1  ;;  %v2023_v38 = vpack.c.bf16 %v1376_v37, %v1375_v1 }
 0x2e3   :  { %v2169_v59 = vpack.i.bf16 %v1125_v22, %v1129_v36  ;;  %v1111_v60 = vadd.f32 %v1110_v14, %v1001_v11  ;;  %v1905_v13 = vpop.f32.mrb[55].mxu1  ;;  %v1377_v22 = vld [vmem:[%s3206_s4 + $0x10] sm:$0xff]  ;;  %v1378_v36 = vld [vmem:[%s3206_s4 + $0x18] sm:$0xff]  ;;  %v1379_v14 = vld [vmem:[%s3206_s4 + $0x20] sm:$0xff] }
 0x2e4   :  { %v2026_v11 = vpack.c.bf16 %v1378_v36, %v1377_v22  ;;  %v1381_v13 = vld [vmem:[%s3206_s4 + $0x30] sm:$0x3] }
 0x2e5   :  { %v1130_v54 = vmax.f32 %v1111_v60, 0.0  ;;  %2170 = vrot.lane.b32.xlu1 %v2169_v59, %s2191_s15  ;;  %v1380_v59 = vld [vmem:[%s3206_s4 + $0x28] sm:$0xff] }
 0x2e6   :  { %v1115_v5 = vpop.f32.mrb[56].mxu1  ;;  %v2029_v60 = vpack.c.bf16 %v1380_v59, %v1379_v14 }
 0x2e7   :  { %v2174_v51 = vpack.i.bf16 %v1126_v6, %v1130_v54  ;;  %v1116_v9 = vadd.f32 %v1115_v5, %v1006_v16  ;;  %v1908_v15 = vpop.f32.mrb[57].mxu1 }
 0x2e9   :  { %v1131_v2 = vmax.f32 %v1116_v9, 0.0  ;;  %2175 = vrot.lane.b32.xlu0 %v2174_v51, %s2192_s17  ;;  %v1541_v51 = vld [vmem:[%s3205_s6 + $0x1] ss:$0 sm:$0xff]  ;;  %s2194_s17 = smov 50  }
 0x2ea   :  { %v1120_v20 = vpop.f32.mrb[58].mxu1 }
 0x2eb   :  { %v2179_v19 = vpack.i.bf16 %v1127_v23, %v1131_v2  ;;  %v1121_v28 = vadd.f32 %v1120_v20, %v1011_v52  ;;  %v1911_v35 = vpop.f32.mrb[59].mxu1  ;;  %v1543_v2 = vld [vmem:[%s3207_s7] ss:$0 sm:$0xff] }
 0x2ed   :  { %2180 = vrot.lane.b32.xlu1 %v2179_v19, %s2193_s18  ;;  %v1132_v56 = vmax.f32 %v1121_v28, 0.0 }
 0x357   :  { %v2171_v55 = vpop.permute.xlu1 %2170 }
 0x358   :  { %v2173_v45 = vunpack.i.h.bf16 %v2171_v55  ;;  %v2172_v32 = vunpack.i.l.bf16 %v2171_v55 }
 0x35a   :  { %v1157_v50 = vsel %vm787_vm3, %v1124_v3, %v2173_v45  ;;  %v1160_v53 = vsel %vm787_vm3, %v1128_v49, %v2172_v32 }
 0x35b   :  { %v2176_v27 = vpop.permute.xlu0 %2175 }
 0x35c   :  { %v2178_v41 = vunpack.i.h.bf16 %v2176_v27  ;;  %v2177_v61 = vunpack.i.l.bf16 %v2176_v27 }
 0x35e   :  { %v1158_v24 = vsel %vm797_vm4, %v1157_v50, %v2178_v41  ;;  %v1161_v34 = vsel %vm797_vm4, %v1160_v53, %v2177_v61 }
 0x35f   :  { %v2181_v8 = vpop.permute.xlu1 %2180 }
 0x360   :  { %v2183_v57 = vunpack.i.h.bf16 %v2181_v8  ;;  %v2182_v43 = vunpack.i.l.bf16 %v2181_v8 }
 0x362   :  { %v1162_v33 = vsel %vm807_vm5, %v1161_v34, %v2182_v43  ;;  %v1159_v21 = vsel %vm807_vm5, %v1158_v24, %v2183_v57 }
 0x363   :  { %1271 = vmatprep.mubr.f32.mxu1 %v1162_v33 }
 0x364   :  { %1272 = vmatmul.mubr.f32.vlgmr.msra.gmra.mrb[60].mxu1 %v1159_v21 }
 0x365   :  { %2018 = vmatpush3.bf16.msra.mxu1 %v2017_v40  ;;  %1920 = vmatprep.mubr.msk.f32.mxu1 %vm2189_vm0, %v2190_v4 }
 0x366   :  { %2019 = vmatprep.subr.bf16.mxu1 %v2188_v0 }
 0x369   :  { %2021 = vmatpush3.bf16.msra.mxu1 %v2020_v48 }
 0x36a   :  { %2022 = vmatprep.subr.bf16.mxu1 %v2188_v0 }
 0x36c   :  { %1921 = vmatmul.mubr.msk.f32.vlgmr.msra.gmra.mrb[62].mxu1 %vm787_vm3, %v1132_v56 }
 0x36d   :  { %1937 = vmatprep.mubr.msk.f32.mxu1 %vm2189_vm0, %v2190_v4  ;;  %2024 = vmatpush3.bf16.msra.mxu1 %v2023_v38 }
 0x36e   :  { %2025 = vmatprep.subr.bf16.mxu1 %v2188_v0 }
 0x371   :  { %2027 = vmatpush3.bf16.msra.mxu1 %v2026_v11 }
 0x372   :  { %2028 = vmatprep.subr.bf16.mxu1 %v2188_v0  ;;  %v1542_v0 = vld [vmem:[%s3205_s6 + $0x2] ss:$0 sm:$0xff] }
 0x375   :  { %2030 = vmatpush3.bf16.msra.mxu1 %v2029_v60 }
 0x376   :  { %1935 = vmatprep.subr.mxu1 %v2190_v4 }
 0x379   :  { %1936 = vmatpush3.msk.msra.mxu1 %vm1392_vm7, %v1381_v13 }
 0x437   :  { %v1704_v29 = vpop.f32.mrb[60].mxu1 }
 0x438   :  { %v1705_v12 = vpop.f32.mrb[61].mxu1 }
 0x439   :  { %v1706_v10 = vadd.f32 %v1705_v12, %v1704_v29 }
 0x43b   :  { %v1274_v47 = vadd.f32 %v1706_v10, %v1539_v42 }
 0x43f   :  { %v1343_v26 = vpop.f32.mrb[62].mxu1 }
 0x440   :  { %v1344_v62 = vadd.f32 %v1343_v26, %v1274_v47  ;;  %v1922_v7 = vpop.f32.mrb[63].mxu1 }
 0x442   :  { %v1348_v30 = vsel %vm1347_vm6, %v1344_v62, 0.0 }
 0x443   :  { %1349 = vadd.xlane.f32.xlu0 %v1348_v30 }
 0x4d0   :  { %v1350_v63 = vpop.xlane.xlu0 %1349 }
 0x4d1   :  { %v1352_v58 = vmul.f32 0.02, %v1350_v63 }
 0x4d3   :  { %v1353_v25 = vsub.f32 %v1344_v62, %v1352_v58 }
 0x4d5   :  { %v1354_v44 = vmul.f32 %v1353_v25, %v1353_v25 }
 0x4d7   :  { %v1355_v31 = vsel %vm1347_vm6, %v1354_v44, 0.0 }
 0x4d8   :  { %1356 = vadd.xlane.f32.xlu1 %v1355_v31 }
 0x565   :  { %v1357_v6 = vpop.xlane.xlu1 %1356 }
 0x566   :  { %v1358_v54 = vmul.f32 0.02, %v1357_v6 }
 0x568   :  { %v1359_v16 = vadd.f32 1e-05, %v1358_v54 }
 0x56a   :  { %2184 = vrsqrt.f32 %v1359_v16 }
 0x574   :  { %v2185_v5 = vpop.eup %2184 }
 0x575   :  { %v1361_v9 = vmul.f32 %v2185_v5, %v1353_v25 }
 0x577   :  { %v1367_v4 = vmul.f32 %v1541_v51, %v1361_v9 }
 0x579   :  { %v1373_v15 = vadd.f32 %v1542_v0, %v1367_v4 }
 0x57b   :  { %2186 = vtanh.f32 %v1373_v15 }
 0x585   :  { %v2187_v23 = vpop.eup %2186 }
 0x586   :  { %1938 = vmatmul.mubr.msk.f32.vlgmr.msra.gmra.mrb[64].mxu1 %vm1347_vm6, %v2187_v23 }
 0x659   :  { %v1462_v52 = vpop.f32.mrb[64].mxu1 }
 0x65a   :  { %v1463_v20 = vadd.f32 %v1543_v2, %v1462_v52  ;;  %v1939_v19 = vpop.f32.mrb[65].mxu1 }
 0x65c   :  { %1467 = vrot.lane.b32.xlu0 %v1463_v20, %s2194_s17 }
 0x6ce   :  { %v1468_v28 = vpop.permute.xlu0 %1467 }
 0x6cf   :  { %v1470_v35 = vsel %vm1347_vm6, %v2187_v23, %v1468_v28 }
 0x6d0   :  { %v1472_v55 = vsel %vm1471_vm8, %v1470_v35, 0.0 }
 0x6d1   :  { %1473 = vst [vmem:[%s3208_s8] sm:$0xff] %v1472_v55 }

</bundles_post_ra>
